<compile_context>
chip_gen: v6e
topology: v6e:2x2x1
jax: 0.10.0
libtpu: 0.0.40
codegen_flags: <defaults>
</compile_context>

<pallas_src>
import functools
import math

import jax
import jax.numpy as jnp
from jax.experimental import pallas as pl
from jax.experimental.pallas import tpu as pltpu

# ----------------------------- model sizes ---------------------------------
D_MODEL = 32      # args.d_model
NHEAD   = 4       # args.nhead
DIM_F   = 64      # args.dim_feedforward
LAYERS  = 2       # args.layers
SEQ     = 8
BATCH   = 2
LN_EPS  = 1e-5
# TODO(synk): dropout is treated as 0 (eval-mode semantics); stochastic
# dropout during training is not reproduced here.


# ------------------------------- kernel ------------------------------------
def _layernorm(x, w, b):
    mu = jnp.mean(x, axis=-1, keepdims=True)
    var = jnp.mean((x - mu) ** 2, axis=-1, keepdims=True)
    return (x - mu) * jax.lax.rsqrt(var + LN_EPS) * w + b


def gpt_idm_kernel(x_ref, mask_ref,
                   wqkv_ref, bqkv_ref, wo_ref, bo_ref,
                   ln1w_ref, ln1b_ref,
                   w1_ref, b1_ref, w2_ref, b2_ref,
                   ln2w_ref, ln2b_ref,
                   out_ref, *, nhead):
    S, B, D = x_ref.shape
    L = wqkv_ref.shape[0]
    dh = D // nhead
    scale = 1.0 / math.sqrt(dh)

    mask = mask_ref[...]                      # (S, S) additive attention mask
    x_sbd = x_ref[...]                        # (S, B, D) seq-first (PyTorch)

    # Batch-major activation slab (B*S, D): all row-wise dense ops run on the
    # full slab in one shot (keeps sublanes fuller than per-batch tiles).
    x = jnp.concatenate([x_sbd[:, b, :] for b in range(B)], axis=0)

    for l in range(L):                        # both encoder layers fused
        # ---- self attention -------------------------------------------
        qkv = jnp.dot(x, wqkv_ref[l], preferred_element_type=jnp.float32)
        qkv = qkv + bqkv_ref[l]               # (B*S, 3D)
        qkv3 = qkv.reshape(B, S, 3 * D)       # contiguous split of row dim
        q = qkv3[..., :D]
        k = qkv3[..., D:2 * D]
        v = qkv3[..., 2 * D:]

        # Per-head attention, batched over B via 3-D dot_generals
        # (no explicit transposes, no per-(batch,head) tiny matmuls).
        heads = []
        for h in range(nhead):
            hs = slice(h * dh, (h + 1) * dh)
            s = jnp.einsum('bqd,bkd->bqk', q[..., hs], k[..., hs],
                           preferred_element_type=jnp.float32) * scale
            s = s + mask                      # broadcast over batch
            s = s - jnp.max(s, axis=-1, keepdims=True)
            e = jnp.exp(s)
            p = e * pl.reciprocal(jnp.sum(e, axis=-1, keepdims=True),
                                  approx=True)
            heads.append(jnp.einsum('bqk,bkd->bqd', p, v[..., hs],
                                    preferred_element_type=jnp.float32))
        attn = jnp.concatenate(heads, axis=-1).reshape(B * S, D)
        attn = jnp.dot(attn, wo_ref[l],
                       preferred_element_type=jnp.float32) + bo_ref[l]

        # ---- residual + norm1 -------------------------------------------
        x1 = _layernorm(x + attn, ln1w_ref[l], ln1b_ref[l])

        # ---- feed forward -------------------------------------------------
        h1 = jnp.dot(x1, w1_ref[l], preferred_element_type=jnp.float32)
        h1 = jnp.maximum(h1 + b1_ref[l], 0.0)            # ReLU
        ff = jnp.dot(h1, w2_ref[l],
                     preferred_element_type=jnp.float32) + b2_ref[l]

        # ---- residual + norm2 -------------------------------------------
        x = _layernorm(x1 + ff, ln2w_ref[l], ln2b_ref[l])

    # Write back in seq-first (S, B, D) layout (static size-1 window stores).
    y = x.reshape(B, S, D)
    for b in range(B):
        out_ref[:, b:b + 1, :] = y[b].reshape(S, 1, D)


def gpt_idm_forward(x_sbd, params, mask=None, *, nhead=NHEAD):
    """x_sbd: (S, B, D) like PyTorch's default seq-first layout."""
    S, B, D = x_sbd.shape
    if mask is None:
        mask = jnp.zeros((S, S), jnp.float32)

    vmem = lambda: pl.BlockSpec(memory_space=pltpu.MemorySpace.VMEM)
    kernel = functools.partial(gpt_idm_kernel, nhead=nhead)
    return pl.pallas_call(
        kernel,
        out_shape=jax.ShapeDtypeStruct((S, B, D), jnp.float32),
        in_specs=[vmem() for _ in range(14)],
        out_specs=vmem(),
    )(x_sbd, mask,
      params["wqkv_t"], params["bqkv"], params["wo_t"], params["bo"],
      params["ln1w"], params["ln1b"],
      params["w1_t"], params["b1"], params["w2_t"], params["b2"],
      params["ln2w"], params["ln2b"])


# ------------------------ deterministic parameters --------------------------
def init_params(key, d_model, dim_f, layers):
    """Per-layer weights stacked along a leading layer axis."""
    per = {k: [] for k in ("wqkv_t", "bqkv", "wo_t", "bo", "ln1w", "ln1b",
                           "w1_t", "b1", "w2_t", "b2", "ln2w", "ln2b")}
    s = 0.05
    for l in range(layers):
        ks = jax.random.split(jax.random.fold_in(key, l), 8)
        wqkv = jax.random.normal(ks[0], (3 * d_model, d_model), jnp.float32) * s
        bqkv = jax.random.normal(ks[1], (3 * d_model,), jnp.float32) * s
        wo = jax.random.normal(ks[2], (d_model, d_model), jnp.float32) * s
        bo = jax.random.normal(ks[3], (d_model,), jnp.float32) * s
        w1 = jax.random.normal(ks[4], (dim_f, d_model), jnp.float32) * s
        b1 = jax.random.normal(ks[5], (dim_f,), jnp.float32) * s
        w2 = jax.random.normal(ks[6], (d_model, dim_f), jnp.float32) * s
        b2 = jax.random.normal(ks[7], (d_model,), jnp.float32) * s
        per["wqkv_t"].append(wqkv.T); per["bqkv"].append(bqkv.reshape(1, -1))
        per["wo_t"].append(wo.T);     per["bo"].append(bo.reshape(1, -1))
        per["ln1w"].append(jnp.ones((1, d_model), jnp.float32))
        per["ln1b"].append(jnp.zeros((1, d_model), jnp.float32))
        per["w1_t"].append(w1.T);     per["b1"].append(b1.reshape(1, -1))
        per["w2_t"].append(w2.T);     per["b2"].append(b2.reshape(1, -1))
        per["ln2w"].append(jnp.ones((1, d_model), jnp.float32))
        per["ln2b"].append(jnp.zeros((1, d_model), jnp.float32))
    return {k: jnp.stack(v) for k, v in per.items()}


# ----------------------------- pure-JAX reference ---------------------------
def reference_forward(x_sbd, params, mask, *, nhead):
    x = jnp.transpose(x_sbd, (1, 0, 2))          # (B, S, D)
    B, S, D = x.shape
    dh = D // nhead
    L = params["wqkv_t"].shape[0]
    for l in range(L):
        qkv = x @ params["wqkv_t"][l] + params["bqkv"][l]
        q, k, v = qkv[..., :D], qkv[..., D:2 * D], qkv[..., 2 * D:]
        q = q.reshape(B, S, nhead, dh).transpose(0, 2, 1, 3)
        k = k.reshape(B, S, nhead, dh).transpose(0, 2, 1, 3)
        v = v.reshape(B, S, nhead, dh).transpose(0, 2, 1, 3)
        s = jnp.einsum("bhqd,bhkd->bhqk", q, k) / math.sqrt(dh) + mask
        a = jax.nn.softmax(s, axis=-1)
        o = jnp.einsum("bhqk,bhkd->bhqd", a, v)
        o = o.transpose(0, 2, 1, 3).reshape(B, S, D)
        attn = o @ params["wo_t"][l] + params["bo"][l]

        def ln(z, w, b):
            mu = jnp.mean(z, -1, keepdims=True)
            var = jnp.mean((z - mu) ** 2, -1, keepdims=True)
            return (z - mu) * jax.lax.rsqrt(var + LN_EPS) * w + b

        x1 = ln(x + attn, params["ln1w"][l], params["ln1b"][l])
        ff = (jnp.maximum(x1 @ params["w1_t"][l] + params["b1"][l], 0.0)
              @ params["w2_t"][l] + params["b2"][l])
        x = ln(x1 + ff, params["ln2w"][l], params["ln2b"][l])
    return jnp.transpose(x, (1, 0, 2))


# --------------------------------- main --------------------------------------
if __name__ == "__main__":
    key = jax.random.PRNGKey(0)
    k_x, k_p = jax.random.split(key)
    x = jax.random.normal(k_x, (SEQ, BATCH, D_MODEL), jnp.float32)  # (S, B, D)
    params = init_params(k_p, D_MODEL, DIM_F, LAYERS)
    mask = jnp.zeros((SEQ, SEQ), jnp.float32)   # additive attention mask

    out = gpt_idm_forward(x, params, mask, nhead=NHEAD)
    out = jax.block_until_ready(out)

    ref = reference_forward(x, params, mask, nhead=NHEAD)
    assert out.shape == (SEQ, BATCH, D_MODEL)
    # Tolerance slightly loosened because the softmax denominator uses the
    # EUP approximate reciprocal (pl.reciprocal(approx=True)).
    assert jnp.allclose(out, ref, atol=2e-3, rtol=2e-3), "mismatch vs reference"
    print("KERNEL_OK")
</pallas_src>

<mosaic_0001>
module attributes {stable_mosaic.version = 11 : i64} {
  func.func @gpt_idm_kernel(%arg0: memref<8x2x32xf32, #tpu.memory_space<vmem>>, %arg1: memref<8x8xf32, #tpu.memory_space<vmem>>, %arg2: memref<2x32x96xf32, #tpu.memory_space<vmem>>, %arg3: memref<2x1x96xf32, #tpu.memory_space<vmem>>, %arg4: memref<2x32x32xf32, #tpu.memory_space<vmem>>, %arg5: memref<2x1x32xf32, #tpu.memory_space<vmem>>, %arg6: memref<2x1x32xf32, #tpu.memory_space<vmem>>, %arg7: memref<2x1x32xf32, #tpu.memory_space<vmem>>, %arg8: memref<2x32x64xf32, #tpu.memory_space<vmem>>, %arg9: memref<2x1x64xf32, #tpu.memory_space<vmem>>, %arg10: memref<2x64x32xf32, #tpu.memory_space<vmem>>, %arg11: memref<2x1x32xf32, #tpu.memory_space<vmem>>, %arg12: memref<2x1x32xf32, #tpu.memory_space<vmem>>, %arg13: memref<2x1x32xf32, #tpu.memory_space<vmem>>, %arg14: memref<8x2x32xf32, #tpu.memory_space<vmem>>) attributes {dimension_semantics = [], scalar_prefetch = 0 : i64, scratch_operands = 0 : i64, tpu.core_type = #tpu.core_type<tc>} {
    %c0 = arith.constant 0 : index
    %c0_0 = arith.constant 0 : index
    %0 = vector.load %arg1[%c0, %c0_0] : memref<8x8xf32, #tpu.memory_space<vmem>>, vector<8x8xf32>
    %c0_1 = arith.constant 0 : index
    %c0_2 = arith.constant 0 : index
    %c0_3 = arith.constant 0 : index
    %1 = vector.load %arg0[%c0_1, %c0_2, %c0_3] : memref<8x2x32xf32, #tpu.memory_space<vmem>>, vector<8x2x32xf32>
    %2 = vector.extract_strided_slice %1 {offsets = [0, 0, 0], sizes = [8, 1, 32], strides = [1, 1, 1]} : vector<8x2x32xf32> to vector<8x1x32xf32>
    %3 = vector.shape_cast %2 : vector<8x1x32xf32> to vector<8x32xf32>
    %4 = vector.extract_strided_slice %1 {offsets = [0, 1, 0], sizes = [8, 1, 32], strides = [1, 1, 1]} : vector<8x2x32xf32> to vector<8x1x32xf32>
    %5 = vector.shape_cast %4 : vector<8x1x32xf32> to vector<8x32xf32>
    %6 = tpu.concatenate %3, %5 in 0 : vector<8x32xf32>, vector<8x32xf32> -> vector<16x32xf32>
    %c0_4 = arith.constant 0 : index
    %c0_5 = arith.constant 0 : index
    %c0_6 = arith.constant 0 : index
    %7 = vector.load %arg2[%c0_4, %c0_5, %c0_6] : memref<2x32x96xf32, #tpu.memory_space<vmem>>, vector<1x32x96xf32>
    %8 = vector.shape_cast %7 : vector<1x32x96xf32> to vector<32x96xf32>
    %cst = arith.constant dense<0.000000e+00> : vector<16x96xf32>
    %9 = tpu.matmul %6, %8, %cst {dimension_numbers = #tpu.dot_dimension_numbers<[1], [0], [0], [1], [0, 0, 1, 1], [], []>} : vector<16x32xf32>, vector<32x96xf32>, vector<16x96xf32> -> vector<16x96xf32>
    %c0_7 = arith.constant 0 : index
    %c0_8 = arith.constant 0 : index
    %c0_9 = arith.constant 0 : index
    %10 = vector.load %arg3[%c0_7, %c0_8, %c0_9] : memref<2x1x96xf32, #tpu.memory_space<vmem>>, vector<1x1x96xf32>
    %11 = vector.shape_cast %10 : vector<1x1x96xf32> to vector<1x96xf32>
    %12 = vector.broadcast %11 : vector<1x96xf32> to vector<16x96xf32>
    %13 = arith.addf %9, %12 : vector<16x96xf32>
    %14 = vector.shape_cast %13 : vector<16x96xf32> to vector<2x8x96xf32>
    %15 = vector.extract_strided_slice %14 {offsets = [0, 0, 0], sizes = [2, 8, 32], strides = [1, 1, 1]} : vector<2x8x96xf32> to vector<2x8x32xf32>
    %16 = vector.extract_strided_slice %14 {offsets = [0, 0, 32], sizes = [2, 8, 32], strides = [1, 1, 1]} : vector<2x8x96xf32> to vector<2x8x32xf32>
    %17 = vector.extract_strided_slice %14 {offsets = [0, 0, 64], sizes = [2, 8, 32], strides = [1, 1, 1]} : vector<2x8x96xf32> to vector<2x8x32xf32>
    %18 = vector.extract_strided_slice %15 {offsets = [0, 0, 0], sizes = [2, 8, 8], strides = [1, 1, 1]} : vector<2x8x32xf32> to vector<2x8x8xf32>
    %19 = vector.extract_strided_slice %16 {offsets = [0, 0, 0], sizes = [2, 8, 8], strides = [1, 1, 1]} : vector<2x8x32xf32> to vector<2x8x8xf32>
    "tpu.trace_start"() <{level = 10 : i32, message = "bqd,bkd->bqk"}> : () -> ()
    %cst_10 = arith.constant dense<0.000000e+00> : vector<2x8x8xf32>
    %20 = tpu.matmul %18, %19, %cst_10 {dimension_numbers = #tpu.dot_dimension_numbers<[2], [2], [1], [1], [0, 0, 0, 1, 1, 1], [0], [0]>} : vector<2x8x8xf32>, vector<2x8x8xf32>, vector<2x8x8xf32> -> vector<2x8x8xf32>
    "tpu.trace_stop"() : () -> ()
    %cst_11 = arith.constant 0.353553385 : f32
    %21 = vector.broadcast %cst_11 : f32 to vector<2x8x8xf32>
    %22 = arith.mulf %20, %21 : vector<2x8x8xf32>
    %23 = vector.shape_cast %0 : vector<8x8xf32> to vector<1x8x8xf32>
    %24 = vector.broadcast %23 : vector<1x8x8xf32> to vector<2x8x8xf32>
    %25 = arith.addf %22, %24 : vector<2x8x8xf32>
    %cst_12 = arith.constant dense<0xFF800000> : vector<2x8xf32>
    %26 = vector.multi_reduction <maximumf>, %25, %cst_12 [2] : vector<2x8x8xf32> to vector<2x8xf32>
    %27 = vector.shape_cast %26 : vector<2x8xf32> to vector<2x8x1xf32>
    %28 = vector.broadcast %27 : vector<2x8x1xf32> to vector<2x8x8xf32>
    %29 = arith.subf %25, %28 : vector<2x8x8xf32>
    %30 = math.exp %29 : vector<2x8x8xf32>
    %cst_13 = arith.constant dense<0.000000e+00> : vector<2x8xf32>
    %31 = vector.multi_reduction <add>, %30, %cst_13 [2] : vector<2x8x8xf32> to vector<2x8xf32>
    %32 = vector.shape_cast %31 : vector<2x8xf32> to vector<2x8x1xf32>
    %33 = tpu.reciprocal %32 {approx = true} : vector<2x8x1xf32> -> vector<2x8x1xf32>
    %34 = vector.broadcast %33 : vector<2x8x1xf32> to vector<2x8x8xf32>
    %35 = arith.mulf %30, %34 : vector<2x8x8xf32>
    %36 = vector.extract_strided_slice %17 {offsets = [0, 0, 0], sizes = [2, 8, 8], strides = [1, 1, 1]} : vector<2x8x32xf32> to vector<2x8x8xf32>
    "tpu.trace_start"() <{level = 10 : i32, message = "bqk,bkd->bqd"}> : () -> ()
    %cst_14 = arith.constant dense<0.000000e+00> : vector<2x8x8xf32>
    %37 = tpu.matmul %35, %36, %cst_14 {dimension_numbers = #tpu.dot_dimension_numbers<[2], [1], [1], [2], [0, 0, 0, 1, 1, 2], [0], [0]>} : vector<2x8x8xf32>, vector<2x8x8xf32>, vector<2x8x8xf32> -> vector<2x8x8xf32>
    "tpu.trace_stop"() : () -> ()
    %38 = vector.extract_strided_slice %15 {offsets = [0, 0, 8], sizes = [2, 8, 8], strides = [1, 1, 1]} : vector<2x8x32xf32> to vector<2x8x8xf32>
    %39 = vector.extract_strided_slice %16 {offsets = [0, 0, 8], sizes = [2, 8, 8], strides = [1, 1, 1]} : vector<2x8x32xf32> to vector<2x8x8xf32>
    "tpu.trace_start"() <{level = 10 : i32, message = "bqd,bkd->bqk"}> : () -> ()
    %cst_15 = arith.constant dense<0.000000e+00> : vector<2x8x8xf32>
    %40 = tpu.matmul %38, %39, %cst_15 {dimension_numbers = #tpu.dot_dimension_numbers<[2], [2], [1], [1], [0, 0, 0, 1, 1, 1], [0], [0]>} : vector<2x8x8xf32>, vector<2x8x8xf32>, vector<2x8x8xf32> -> vector<2x8x8xf32>
    "tpu.trace_stop"() : () -> ()
    %cst_16 = arith.constant 0.353553385 : f32
    %41 = vector.broadcast %cst_16 : f32 to vector<2x8x8xf32>
    %42 = arith.mulf %40, %41 : vector<2x8x8xf32>
    %43 = vector.shape_cast %0 : vector<8x8xf32> to vector<1x8x8xf32>
    %44 = vector.broadcast %43 : vector<1x8x8xf32> to vector<2x8x8xf32>
    %45 = arith.addf %42, %44 : vector<2x8x8xf32>
    %cst_17 = arith.constant dense<0xFF800000> : vector<2x8xf32>
    %46 = vector.multi_reduction <maximumf>, %45, %cst_17 [2] : vector<2x8x8xf32> to vector<2x8xf32>
    %47 = vector.shape_cast %46 : vector<2x8xf32> to vector<2x8x1xf32>
    %48 = vector.broadcast %47 : vector<2x8x1xf32> to vector<2x8x8xf32>
    %49 = arith.subf %45, %48 : vector<2x8x8xf32>
    %50 = math.exp %49 : vector<2x8x8xf32>
    %cst_18 = arith.constant dense<0.000000e+00> : vector<2x8xf32>
    %51 = vector.multi_reduction <add>, %50, %cst_18 [2] : vector<2x8x8xf32> to vector<2x8xf32>
    %52 = vector.shape_cast %51 : vector<2x8xf32> to vector<2x8x1xf32>
    %53 = tpu.reciprocal %52 {approx = true} : vector<2x8x1xf32> -> vector<2x8x1xf32>
    %54 = vector.broadcast %53 : vector<2x8x1xf32> to vector<2x8x8xf32>
    %55 = arith.mulf %50, %54 : vector<2x8x8xf32>
    %56 = vector.extract_strided_slice %17 {offsets = [0, 0, 8], sizes = [2, 8, 8], strides = [1, 1, 1]} : vector<2x8x32xf32> to vector<2x8x8xf32>
    "tpu.trace_start"() <{level = 10 : i32, message = "bqk,bkd->bqd"}> : () -> ()
    %cst_19 = arith.constant dense<0.000000e+00> : vector<2x8x8xf32>
    %57 = tpu.matmul %55, %56, %cst_19 {dimension_numbers = #tpu.dot_dimension_numbers<[2], [1], [1], [2], [0, 0, 0, 1, 1, 2], [0], [0]>} : vector<2x8x8xf32>, vector<2x8x8xf32>, vector<2x8x8xf32> -> vector<2x8x8xf32>
    "tpu.trace_stop"() : () -> ()
    %58 = vector.extract_strided_slice %15 {offsets = [0, 0, 16], sizes = [2, 8, 8], strides = [1, 1, 1]} : vector<2x8x32xf32> to vector<2x8x8xf32>
    %59 = vector.extract_strided_slice %16 {offsets = [0, 0, 16], sizes = [2, 8, 8], strides = [1, 1, 1]} : vector<2x8x32xf32> to vector<2x8x8xf32>
    "tpu.trace_start"() <{level = 10 : i32, message = "bqd,bkd->bqk"}> : () -> ()
    %cst_20 = arith.constant dense<0.000000e+00> : vector<2x8x8xf32>
    %60 = tpu.matmul %58, %59, %cst_20 {dimension_numbers = #tpu.dot_dimension_numbers<[2], [2], [1], [1], [0, 0, 0, 1, 1, 1], [0], [0]>} : vector<2x8x8xf32>, vector<2x8x8xf32>, vector<2x8x8xf32> -> vector<2x8x8xf32>
    "tpu.trace_stop"() : () -> ()
    %cst_21 = arith.constant 0.353553385 : f32
    %61 = vector.broadcast %cst_21 : f32 to vector<2x8x8xf32>
    %62 = arith.mulf %60, %61 : vector<2x8x8xf32>
    %63 = vector.shape_cast %0 : vector<8x8xf32> to vector<1x8x8xf32>
    %64 = vector.broadcast %63 : vector<1x8x8xf32> to vector<2x8x8xf32>
    %65 = arith.addf %62, %64 : vector<2x8x8xf32>
    %cst_22 = arith.constant dense<0xFF800000> : vector<2x8xf32>
    %66 = vector.multi_reduction <maximumf>, %65, %cst_22 [2] : vector<2x8x8xf32> to vector<2x8xf32>
    %67 = vector.shape_cast %66 : vector<2x8xf32> to vector<2x8x1xf32>
    %68 = vector.broadcast %67 : vector<2x8x1xf32> to vector<2x8x8xf32>
    %69 = arith.subf %65, %68 : vector<2x8x8xf32>
    %70 = math.exp %69 : vector<2x8x8xf32>
    %cst_23 = arith.constant dense<0.000000e+00> : vector<2x8xf32>
    %71 = vector.multi_reduction <add>, %70, %cst_23 [2] : vector<2x8x8xf32> to vector<2x8xf32>
    %72 = vector.shape_cast %71 : vector<2x8xf32> to vector<2x8x1xf32>
    %73 = tpu.reciprocal %72 {approx = true} : vector<2x8x1xf32> -> vector<2x8x1xf32>
    %74 = vector.broadcast %73 : vector<2x8x1xf32> to vector<2x8x8xf32>
    %75 = arith.mulf %70, %74 : vector<2x8x8xf32>
    %76 = vector.extract_strided_slice %17 {offsets = [0, 0, 16], sizes = [2, 8, 8], strides = [1, 1, 1]} : vector<2x8x32xf32> to vector<2x8x8xf32>
    "tpu.trace_start"() <{level = 10 : i32, message = "bqk,bkd->bqd"}> : () -> ()
    %cst_24 = arith.constant dense<0.000000e+00> : vector<2x8x8xf32>
    %77 = tpu.matmul %75, %76, %cst_24 {dimension_numbers = #tpu.dot_dimension_numbers<[2], [1], [1], [2], [0, 0, 0, 1, 1, 2], [0], [0]>} : vector<2x8x8xf32>, vector<2x8x8xf32>, vector<2x8x8xf32> -> vector<2x8x8xf32>
    "tpu.trace_stop"() : () -> ()
    %78 = vector.extract_strided_slice %15 {offsets = [0, 0, 24], sizes = [2, 8, 8], strides = [1, 1, 1]} : vector<2x8x32xf32> to vector<2x8x8xf32>
    %79 = vector.extract_strided_slice %16 {offsets = [0, 0, 24], sizes = [2, 8, 8], strides = [1, 1, 1]} : vector<2x8x32xf32> to vector<2x8x8xf32>
    "tpu.trace_start"() <{level = 10 : i32, message = "bqd,bkd->bqk"}> : () -> ()
    %cst_25 = arith.constant dense<0.000000e+00> : vector<2x8x8xf32>
    %80 = tpu.matmul %78, %79, %cst_25 {dimension_numbers = #tpu.dot_dimension_numbers<[2], [2], [1], [1], [0, 0, 0, 1, 1, 1], [0], [0]>} : vector<2x8x8xf32>, vector<2x8x8xf32>, vector<2x8x8xf32> -> vector<2x8x8xf32>
    "tpu.trace_stop"() : () -> ()
    %cst_26 = arith.constant 0.353553385 : f32
    %81 = vector.broadcast %cst_26 : f32 to vector<2x8x8xf32>
    %82 = arith.mulf %80, %81 : vector<2x8x8xf32>
    %83 = vector.shape_cast %0 : vector<8x8xf32> to vector<1x8x8xf32>
    %84 = vector.broadcast %83 : vector<1x8x8xf32> to vector<2x8x8xf32>
    %85 = arith.addf %82, %84 : vector<2x8x8xf32>
    %cst_27 = arith.constant dense<0xFF800000> : vector<2x8xf32>
    %86 = vector.multi_reduction <maximumf>, %85, %cst_27 [2] : vector<2x8x8xf32> to vector<2x8xf32>
    %87 = vector.shape_cast %86 : vector<2x8xf32> to vector<2x8x1xf32>
    %88 = vector.broadcast %87 : vector<2x8x1xf32> to vector<2x8x8xf32>
    %89 = arith.subf %85, %88 : vector<2x8x8xf32>
    %90 = math.exp %89 : vector<2x8x8xf32>
    %cst_28 = arith.constant dense<0.000000e+00> : vector<2x8xf32>
    %91 = vector.multi_reduction <add>, %90, %cst_28 [2] : vector<2x8x8xf32> to vector<2x8xf32>
    %92 = vector.shape_cast %91 : vector<2x8xf32> to vector<2x8x1xf32>
    %93 = tpu.reciprocal %92 {approx = true} : vector<2x8x1xf32> -> vector<2x8x1xf32>
    %94 = vector.broadcast %93 : vector<2x8x1xf32> to vector<2x8x8xf32>
    %95 = arith.mulf %90, %94 : vector<2x8x8xf32>
    %96 = vector.extract_strided_slice %17 {offsets = [0, 0, 24], sizes = [2, 8, 8], strides = [1, 1, 1]} : vector<2x8x32xf32> to vector<2x8x8xf32>
    "tpu.trace_start"() <{level = 10 : i32, message = "bqk,bkd->bqd"}> : () -> ()
    %cst_29 = arith.constant dense<0.000000e+00> : vector<2x8x8xf32>
    %97 = tpu.matmul %95, %96, %cst_29 {dimension_numbers = #tpu.dot_dimension_numbers<[2], [1], [1], [2], [0, 0, 0, 1, 1, 2], [0], [0]>} : vector<2x8x8xf32>, vector<2x8x8xf32>, vector<2x8x8xf32> -> vector<2x8x8xf32>
    "tpu.trace_stop"() : () -> ()
    %98 = tpu.concatenate %37, %57, %77, %97 in 2 : vector<2x8x8xf32>, vector<2x8x8xf32>, vector<2x8x8xf32>, vector<2x8x8xf32> -> vector<2x8x32xf32>
    %99 = vector.shape_cast %98 : vector<2x8x32xf32> to vector<16x32xf32>
    %c0_30 = arith.constant 0 : index
    %c0_31 = arith.constant 0 : index
    %c0_32 = arith.constant 0 : index
    %100 = vector.load %arg4[%c0_30, %c0_31, %c0_32] : memref<2x32x32xf32, #tpu.memory_space<vmem>>, vector<1x32x32xf32>
    %101 = vector.shape_cast %100 : vector<1x32x32xf32> to vector<32x32xf32>
    %cst_33 = arith.constant dense<0.000000e+00> : vector<16x32xf32>
    %102 = tpu.matmul %99, %101, %cst_33 {dimension_numbers = #tpu.dot_dimension_numbers<[1], [0], [0], [1], [0, 0, 1, 1], [], []>} : vector<16x32xf32>, vector<32x32xf32>, vector<16x32xf32> -> vector<16x32xf32>
    %c0_34 = arith.constant 0 : index
    %c0_35 = arith.constant 0 : index
    %c0_36 = arith.constant 0 : index
    %103 = vector.load %arg5[%c0_34, %c0_35, %c0_36] : memref<2x1x32xf32, #tpu.memory_space<vmem>>, vector<1x1x32xf32>
    %104 = vector.shape_cast %103 : vector<1x1x32xf32> to vector<1x32xf32>
    %105 = vector.broadcast %104 : vector<1x32xf32> to vector<16x32xf32>
    %106 = arith.addf %102, %105 : vector<16x32xf32>
    %107 = arith.addf %6, %106 : vector<16x32xf32>
    %c0_37 = arith.constant 0 : index
    %c0_38 = arith.constant 0 : index
    %c0_39 = arith.constant 0 : index
    %108 = vector.load %arg6[%c0_37, %c0_38, %c0_39] : memref<2x1x32xf32, #tpu.memory_space<vmem>>, vector<1x1x32xf32>
    %109 = vector.shape_cast %108 : vector<1x1x32xf32> to vector<1x32xf32>
    %c0_40 = arith.constant 0 : index
    %c0_41 = arith.constant 0 : index
    %c0_42 = arith.constant 0 : index
    %110 = vector.load %arg7[%c0_40, %c0_41, %c0_42] : memref<2x1x32xf32, #tpu.memory_space<vmem>>, vector<1x1x32xf32>
    %111 = vector.shape_cast %110 : vector<1x1x32xf32> to vector<1x32xf32>
    %cst_43 = arith.constant dense<0.000000e+00> : vector<16xf32>
    %112 = vector.multi_reduction <add>, %107, %cst_43 [1] : vector<16x32xf32> to vector<16xf32>
    %113 = vector.shape_cast %112 : vector<16xf32> to vector<16x1xf32>
    %cst_44 = arith.constant 3.200000e+01 : f32
    %114 = vector.broadcast %cst_44 : f32 to vector<16x1xf32>
    %115 = arith.divf %113, %114 : vector<16x1xf32>
    %116 = vector.broadcast %115 : vector<16x1xf32> to vector<16x32xf32>
    %117 = arith.subf %107, %116 : vector<16x32xf32>
    %118 = arith.mulf %117, %117 : vector<16x32xf32>
    %cst_45 = arith.constant dense<0.000000e+00> : vector<16xf32>
    %119 = vector.multi_reduction <add>, %118, %cst_45 [1] : vector<16x32xf32> to vector<16xf32>
    %120 = vector.shape_cast %119 : vector<16xf32> to vector<16x1xf32>
    %cst_46 = arith.constant 3.200000e+01 : f32
    %121 = vector.broadcast %cst_46 : f32 to vector<16x1xf32>
    %122 = arith.divf %120, %121 : vector<16x1xf32>
    %123 = vector.broadcast %115 : vector<16x1xf32> to vector<16x32xf32>
    %124 = arith.subf %107, %123 : vector<16x32xf32>
    %cst_47 = arith.constant 9.99999974E-6 : f32
    %125 = vector.broadcast %cst_47 : f32 to vector<16x1xf32>
    %126 = arith.addf %122, %125 : vector<16x1xf32>
    %127 = math.rsqrt %126 : vector<16x1xf32>
    %128 = vector.broadcast %127 : vector<16x1xf32> to vector<16x32xf32>
    %129 = arith.mulf %124, %128 : vector<16x32xf32>
    %130 = vector.broadcast %109 : vector<1x32xf32> to vector<16x32xf32>
    %131 = arith.mulf %129, %130 : vector<16x32xf32>
    %132 = vector.broadcast %111 : vector<1x32xf32> to vector<16x32xf32>
    %133 = arith.addf %131, %132 : vector<16x32xf32>
    %c0_48 = arith.constant 0 : index
    %c0_49 = arith.constant 0 : index
    %c0_50 = arith.constant 0 : index
    %134 = vector.load %arg8[%c0_48, %c0_49, %c0_50] : memref<2x32x64xf32, #tpu.memory_space<vmem>>, vector<1x32x64xf32>
    %135 = vector.shape_cast %134 : vector<1x32x64xf32> to vector<32x64xf32>
    %cst_51 = arith.constant dense<0.000000e+00> : vector<16x64xf32>
    %136 = tpu.matmul %133, %135, %cst_51 {dimension_numbers = #tpu.dot_dimension_numbers<[1], [0], [0], [1], [0, 0, 1, 1], [], []>} : vector<16x32xf32>, vector<32x64xf32>, vector<16x64xf32> -> vector<16x64xf32>
    %c0_52 = arith.constant 0 : index
    %c0_53 = arith.constant 0 : index
    %c0_54 = arith.constant 0 : index
    %137 = vector.load %arg9[%c0_52, %c0_53, %c0_54] : memref<2x1x64xf32, #tpu.memory_space<vmem>>, vector<1x1x64xf32>
    %138 = vector.shape_cast %137 : vector<1x1x64xf32> to vector<1x64xf32>
    %139 = vector.broadcast %138 : vector<1x64xf32> to vector<16x64xf32>
    %140 = arith.addf %136, %139 : vector<16x64xf32>
    %cst_55 = arith.constant 0.000000e+00 : f32
    %141 = vector.broadcast %cst_55 : f32 to vector<16x64xf32>
    %142 = arith.maximumf %140, %141 : vector<16x64xf32>
    %c0_56 = arith.constant 0 : index
    %c0_57 = arith.constant 0 : index
    %c0_58 = arith.constant 0 : index
    %143 = vector.load %arg10[%c0_56, %c0_57, %c0_58] : memref<2x64x32xf32, #tpu.memory_space<vmem>>, vector<1x64x32xf32>
    %144 = vector.shape_cast %143 : vector<1x64x32xf32> to vector<64x32xf32>
    %cst_59 = arith.constant dense<0.000000e+00> : vector<16x32xf32>
    %145 = tpu.matmul %142, %144, %cst_59 {dimension_numbers = #tpu.dot_dimension_numbers<[1], [0], [0], [1], [0, 0, 1, 1], [], []>} : vector<16x64xf32>, vector<64x32xf32>, vector<16x32xf32> -> vector<16x32xf32>
    %c0_60 = arith.constant 0 : index
    %c0_61 = arith.constant 0 : index
    %c0_62 = arith.constant 0 : index
    %146 = vector.load %arg11[%c0_60, %c0_61, %c0_62] : memref<2x1x32xf32, #tpu.memory_space<vmem>>, vector<1x1x32xf32>
    %147 = vector.shape_cast %146 : vector<1x1x32xf32> to vector<1x32xf32>
    %148 = vector.broadcast %147 : vector<1x32xf32> to vector<16x32xf32>
    %149 = arith.addf %145, %148 : vector<16x32xf32>
    %150 = arith.addf %133, %149 : vector<16x32xf32>
    %c0_63 = arith.constant 0 : index
    %c0_64 = arith.constant 0 : index
    %c0_65 = arith.constant 0 : index
    %151 = vector.load %arg12[%c0_63, %c0_64, %c0_65] : memref<2x1x32xf32, #tpu.memory_space<vmem>>, vector<1x1x32xf32>
    %152 = vector.shape_cast %151 : vector<1x1x32xf32> to vector<1x32xf32>
    %c0_66 = arith.constant 0 : index
    %c0_67 = arith.constant 0 : index
    %c0_68 = arith.constant 0 : index
    %153 = vector.load %arg13[%c0_66, %c0_67, %c0_68] : memref<2x1x32xf32, #tpu.memory_space<vmem>>, vector<1x1x32xf32>
    %154 = vector.shape_cast %153 : vector<1x1x32xf32> to vector<1x32xf32>
    %cst_69 = arith.constant dense<0.000000e+00> : vector<16xf32>
    %155 = vector.multi_reduction <add>, %150, %cst_69 [1] : vector<16x32xf32> to vector<16xf32>
    %156 = vector.shape_cast %155 : vector<16xf32> to vector<16x1xf32>
    %cst_70 = arith.constant 3.200000e+01 : f32
    %157 = vector.broadcast %cst_70 : f32 to vector<16x1xf32>
    %158 = arith.divf %156, %157 : vector<16x1xf32>
    %159 = vector.broadcast %158 : vector<16x1xf32> to vector<16x32xf32>
    %160 = arith.subf %150, %159 : vector<16x32xf32>
    %161 = arith.mulf %160, %160 : vector<16x32xf32>
    %cst_71 = arith.constant dense<0.000000e+00> : vector<16xf32>
    %162 = vector.multi_reduction <add>, %161, %cst_71 [1] : vector<16x32xf32> to vector<16xf32>
    %163 = vector.shape_cast %162 : vector<16xf32> to vector<16x1xf32>
    %cst_72 = arith.constant 3.200000e+01 : f32
    %164 = vector.broadcast %cst_72 : f32 to vector<16x1xf32>
    %165 = arith.divf %163, %164 : vector<16x1xf32>
    %166 = vector.broadcast %158 : vector<16x1xf32> to vector<16x32xf32>
    %167 = arith.subf %150, %166 : vector<16x32xf32>
    %cst_73 = arith.constant 9.99999974E-6 : f32
    %168 = vector.broadcast %cst_73 : f32 to vector<16x1xf32>
    %169 = arith.addf %165, %168 : vector<16x1xf32>
    %170 = math.rsqrt %169 : vector<16x1xf32>
    %171 = vector.broadcast %170 : vector<16x1xf32> to vector<16x32xf32>
    %172 = arith.mulf %167, %171 : vector<16x32xf32>
    %173 = vector.broadcast %152 : vector<1x32xf32> to vector<16x32xf32>
    %174 = arith.mulf %172, %173 : vector<16x32xf32>
    %175 = vector.broadcast %154 : vector<1x32xf32> to vector<16x32xf32>
    %176 = arith.addf %174, %175 : vector<16x32xf32>
    %c1 = arith.constant 1 : index
    %c0_74 = arith.constant 0 : index
    %c0_75 = arith.constant 0 : index
    %177 = vector.load %arg2[%c1, %c0_74, %c0_75] : memref<2x32x96xf32, #tpu.memory_space<vmem>>, vector<1x32x96xf32>
    %178 = vector.shape_cast %177 : vector<1x32x96xf32> to vector<32x96xf32>
    %cst_76 = arith.constant dense<0.000000e+00> : vector<16x96xf32>
    %179 = tpu.matmul %176, %178, %cst_76 {dimension_numbers = #tpu.dot_dimension_numbers<[1], [0], [0], [1], [0, 0, 1, 1], [], []>} : vector<16x32xf32>, vector<32x96xf32>, vector<16x96xf32> -> vector<16x96xf32>
    %c1_77 = arith.constant 1 : index
    %c0_78 = arith.constant 0 : index
    %c0_79 = arith.constant 0 : index
    %180 = vector.load %arg3[%c1_77, %c0_78, %c0_79] : memref<2x1x96xf32, #tpu.memory_space<vmem>>, vector<1x1x96xf32>
    %181 = vector.shape_cast %180 : vector<1x1x96xf32> to vector<1x96xf32>
    %182 = vector.broadcast %181 : vector<1x96xf32> to vector<16x96xf32>
    %183 = arith.addf %179, %182 : vector<16x96xf32>
    %184 = vector.shape_cast %183 : vector<16x96xf32> to vector<2x8x96xf32>
    %185 = vector.extract_strided_slice %184 {offsets = [0, 0, 0], sizes = [2, 8, 32], strides = [1, 1, 1]} : vector<2x8x96xf32> to vector<2x8x32xf32>
    %186 = vector.extract_strided_slice %184 {offsets = [0, 0, 32], sizes = [2, 8, 32], strides = [1, 1, 1]} : vector<2x8x96xf32> to vector<2x8x32xf32>
    %187 = vector.extract_strided_slice %184 {offsets = [0, 0, 64], sizes = [2, 8, 32], strides = [1, 1, 1]} : vector<2x8x96xf32> to vector<2x8x32xf32>
    %188 = vector.extract_strided_slice %185 {offsets = [0, 0, 0], sizes = [2, 8, 8], strides = [1, 1, 1]} : vector<2x8x32xf32> to vector<2x8x8xf32>
    %189 = vector.extract_strided_slice %186 {offsets = [0, 0, 0], sizes = [2, 8, 8], strides = [1, 1, 1]} : vector<2x8x32xf32> to vector<2x8x8xf32>
    "tpu.trace_start"() <{level = 10 : i32, message = "bqd,bkd->bqk"}> : () -> ()
    %cst_80 = arith.constant dense<0.000000e+00> : vector<2x8x8xf32>
    %190 = tpu.matmul %188, %189, %cst_80 {dimension_numbers = #tpu.dot_dimension_numbers<[2], [2], [1], [1], [0, 0, 0, 1, 1, 1], [0], [0]>} : vector<2x8x8xf32>, vector<2x8x8xf32>, vector<2x8x8xf32> -> vector<2x8x8xf32>
    "tpu.trace_stop"() : () -> ()
    %cst_81 = arith.constant 0.353553385 : f32
    %191 = vector.broadcast %cst_81 : f32 to vector<2x8x8xf32>
    %192 = arith.mulf %190, %191 : vector<2x8x8xf32>
    %193 = vector.shape_cast %0 : vector<8x8xf32> to vector<1x8x8xf32>
    %194 = vector.broadcast %193 : vector<1x8x8xf32> to vector<2x8x8xf32>
    %195 = arith.addf %192, %194 : vector<2x8x8xf32>
    %cst_82 = arith.constant dense<0xFF800000> : vector<2x8xf32>
    %196 = vector.multi_reduction <maximumf>, %195, %cst_82 [2] : vector<2x8x8xf32> to vector<2x8xf32>
    %197 = vector.shape_cast %196 : vector<2x8xf32> to vector<2x8x1xf32>
    %198 = vector.broadcast %197 : vector<2x8x1xf32> to vector<2x8x8xf32>
    %199 = arith.subf %195, %198 : vector<2x8x8xf32>
    %200 = math.exp %199 : vector<2x8x8xf32>
    %cst_83 = arith.constant dense<0.000000e+00> : vector<2x8xf32>
    %201 = vector.multi_reduction <add>, %200, %cst_83 [2] : vector<2x8x8xf32> to vector<2x8xf32>
    %202 = vector.shape_cast %201 : vector<2x8xf32> to vector<2x8x1xf32>
    %203 = tpu.reciprocal %202 {approx = true} : vector<2x8x1xf32> -> vector<2x8x1xf32>
    %204 = vector.broadcast %203 : vector<2x8x1xf32> to vector<2x8x8xf32>
    %205 = arith.mulf %200, %204 : vector<2x8x8xf32>
    %206 = vector.extract_strided_slice %187 {offsets = [0, 0, 0], sizes = [2, 8, 8], strides = [1, 1, 1]} : vector<2x8x32xf32> to vector<2x8x8xf32>
    "tpu.trace_start"() <{level = 10 : i32, message = "bqk,bkd->bqd"}> : () -> ()
    %cst_84 = arith.constant dense<0.000000e+00> : vector<2x8x8xf32>
    %207 = tpu.matmul %205, %206, %cst_84 {dimension_numbers = #tpu.dot_dimension_numbers<[2], [1], [1], [2], [0, 0, 0, 1, 1, 2], [0], [0]>} : vector<2x8x8xf32>, vector<2x8x8xf32>, vector<2x8x8xf32> -> vector<2x8x8xf32>
    "tpu.trace_stop"() : () -> ()
    %208 = vector.extract_strided_slice %185 {offsets = [0, 0, 8], sizes = [2, 8, 8], strides = [1, 1, 1]} : vector<2x8x32xf32> to vector<2x8x8xf32>
    %209 = vector.extract_strided_slice %186 {offsets = [0, 0, 8], sizes = [2, 8, 8], strides = [1, 1, 1]} : vector<2x8x32xf32> to vector<2x8x8xf32>
    "tpu.trace_start"() <{level = 10 : i32, message = "bqd,bkd->bqk"}> : () -> ()
    %cst_85 = arith.constant dense<0.000000e+00> : vector<2x8x8xf32>
    %210 = tpu.matmul %208, %209, %cst_85 {dimension_numbers = #tpu.dot_dimension_numbers<[2], [2], [1], [1], [0, 0, 0, 1, 1, 1], [0], [0]>} : vector<2x8x8xf32>, vector<2x8x8xf32>, vector<2x8x8xf32> -> vector<2x8x8xf32>
    "tpu.trace_stop"() : () -> ()
    %cst_86 = arith.constant 0.353553385 : f32
    %211 = vector.broadcast %cst_86 : f32 to vector<2x8x8xf32>
    %212 = arith.mulf %210, %211 : vector<2x8x8xf32>
    %213 = vector.shape_cast %0 : vector<8x8xf32> to vector<1x8x8xf32>
    %214 = vector.broadcast %213 : vector<1x8x8xf32> to vector<2x8x8xf32>
    %215 = arith.addf %212, %214 : vector<2x8x8xf32>
    %cst_87 = arith.constant dense<0xFF800000> : vector<2x8xf32>
    %216 = vector.multi_reduction <maximumf>, %215, %cst_87 [2] : vector<2x8x8xf32> to vector<2x8xf32>
    %217 = vector.shape_cast %216 : vector<2x8xf32> to vector<2x8x1xf32>
    %218 = vector.broadcast %217 : vector<2x8x1xf32> to vector<2x8x8xf32>
    %219 = arith.subf %215, %218 : vector<2x8x8xf32>
    %220 = math.exp %219 : vector<2x8x8xf32>
    %cst_88 = arith.constant dense<0.000000e+00> : vector<2x8xf32>
    %221 = vector.multi_reduction <add>, %220, %cst_88 [2] : vector<2x8x8xf32> to vector<2x8xf32>
    %222 = vector.shape_cast %221 : vector<2x8xf32> to vector<2x8x1xf32>
    %223 = tpu.reciprocal %222 {approx = true} : vector<2x8x1xf32> -> vector<2x8x1xf32>
    %224 = vector.broadcast %223 : vector<2x8x1xf32> to vector<2x8x8xf32>
    %225 = arith.mulf %220, %224 : vector<2x8x8xf32>
    %226 = vector.extract_strided_slice %187 {offsets = [0, 0, 8], sizes = [2, 8, 8], strides = [1, 1, 1]} : vector<2x8x32xf32> to vector<2x8x8xf32>
    "tpu.trace_start"() <{level = 10 : i32, message = "bqk,bkd->bqd"}> : () -> ()
    %cst_89 = arith.constant dense<0.000000e+00> : vector<2x8x8xf32>
    %227 = tpu.matmul %225, %226, %cst_89 {dimension_numbers = #tpu.dot_dimension_numbers<[2], [1], [1], [2], [0, 0, 0, 1, 1, 2], [0], [0]>} : vector<2x8x8xf32>, vector<2x8x8xf32>, vector<2x8x8xf32> -> vector<2x8x8xf32>
    "tpu.trace_stop"() : () -> ()
    %228 = vector.extract_strided_slice %185 {offsets = [0, 0, 16], sizes = [2, 8, 8], strides = [1, 1, 1]} : vector<2x8x32xf32> to vector<2x8x8xf32>
    %229 = vector.extract_strided_slice %186 {offsets = [0, 0, 16], sizes = [2, 8, 8], strides = [1, 1, 1]} : vector<2x8x32xf32> to vector<2x8x8xf32>
    "tpu.trace_start"() <{level = 10 : i32, message = "bqd,bkd->bqk"}> : () -> ()
    %cst_90 = arith.constant dense<0.000000e+00> : vector<2x8x8xf32>
    %230 = tpu.matmul %228, %229, %cst_90 {dimension_numbers = #tpu.dot_dimension_numbers<[2], [2], [1], [1], [0, 0, 0, 1, 1, 1], [0], [0]>} : vector<2x8x8xf32>, vector<2x8x8xf32>, vector<2x8x8xf32> -> vector<2x8x8xf32>
    "tpu.trace_stop"() : () -> ()
    %cst_91 = arith.constant 0.353553385 : f32
    %231 = vector.broadcast %cst_91 : f32 to vector<2x8x8xf32>
    %232 = arith.mulf %230, %231 : vector<2x8x8xf32>
    %233 = vector.shape_cast %0 : vector<8x8xf32> to vector<1x8x8xf32>
    %234 = vector.broadcast %233 : vector<1x8x8xf32> to vector<2x8x8xf32>
    %235 = arith.addf %232, %234 : vector<2x8x8xf32>
    %cst_92 = arith.constant dense<0xFF800000> : vector<2x8xf32>
    %236 = vector.multi_reduction <maximumf>, %235, %cst_92 [2] : vector<2x8x8xf32> to vector<2x8xf32>
    %237 = vector.shape_cast %236 : vector<2x8xf32> to vector<2x8x1xf32>
    %238 = vector.broadcast %237 : vector<2x8x1xf32> to vector<2x8x8xf32>
    %239 = arith.subf %235, %238 : vector<2x8x8xf32>
    %240 = math.exp %239 : vector<2x8x8xf32>
    %cst_93 = arith.constant dense<0.000000e+00> : vector<2x8xf32>
    %241 = vector.multi_reduction <add>, %240, %cst_93 [2] : vector<2x8x8xf32> to vector<2x8xf32>
    %242 = vector.shape_cast %241 : vector<2x8xf32> to vector<2x8x1xf32>
    %243 = tpu.reciprocal %242 {approx = true} : vector<2x8x1xf32> -> vector<2x8x1xf32>
    %244 = vector.broadcast %243 : vector<2x8x1xf32> to vector<2x8x8xf32>
    %245 = arith.mulf %240, %244 : vector<2x8x8xf32>
    %246 = vector.extract_strided_slice %187 {offsets = [0, 0, 16], sizes = [2, 8, 8], strides = [1, 1, 1]} : vector<2x8x32xf32> to vector<2x8x8xf32>
    "tpu.trace_start"() <{level = 10 : i32, message = "bqk,bkd->bqd"}> : () -> ()
    %cst_94 = arith.constant dense<0.000000e+00> : vector<2x8x8xf32>
    %247 = tpu.matmul %245, %246, %cst_94 {dimension_numbers = #tpu.dot_dimension_numbers<[2], [1], [1], [2], [0, 0, 0, 1, 1, 2], [0], [0]>} : vector<2x8x8xf32>, vector<2x8x8xf32>, vector<2x8x8xf32> -> vector<2x8x8xf32>
    "tpu.trace_stop"() : () -> ()
    %248 = vector.extract_strided_slice %185 {offsets = [0, 0, 24], sizes = [2, 8, 8], strides = [1, 1, 1]} : vector<2x8x32xf32> to vector<2x8x8xf32>
    %249 = vector.extract_strided_slice %186 {offsets = [0, 0, 24], sizes = [2, 8, 8], strides = [1, 1, 1]} : vector<2x8x32xf32> to vector<2x8x8xf32>
    "tpu.trace_start"() <{level = 10 : i32, message = "bqd,bkd->bqk"}> : () -> ()
    %cst_95 = arith.constant dense<0.000000e+00> : vector<2x8x8xf32>
    %250 = tpu.matmul %248, %249, %cst_95 {dimension_numbers = #tpu.dot_dimension_numbers<[2], [2], [1], [1], [0, 0, 0, 1, 1, 1], [0], [0]>} : vector<2x8x8xf32>, vector<2x8x8xf32>, vector<2x8x8xf32> -> vector<2x8x8xf32>
    "tpu.trace_stop"() : () -> ()
    %cst_96 = arith.constant 0.353553385 : f32
    %251 = vector.broadcast %cst_96 : f32 to vector<2x8x8xf32>
    %252 = arith.mulf %250, %251 : vector<2x8x8xf32>
    %253 = vector.shape_cast %0 : vector<8x8xf32> to vector<1x8x8xf32>
    %254 = vector.broadcast %253 : vector<1x8x8xf32> to vector<2x8x8xf32>
    %255 = arith.addf %252, %254 : vector<2x8x8xf32>
    %cst_97 = arith.constant dense<0xFF800000> : vector<2x8xf32>
    %256 = vector.multi_reduction <maximumf>, %255, %cst_97 [2] : vector<2x8x8xf32> to vector<2x8xf32>
    %257 = vector.shape_cast %256 : vector<2x8xf32> to vector<2x8x1xf32>
    %258 = vector.broadcast %257 : vector<2x8x1xf32> to vector<2x8x8xf32>
    %259 = arith.subf %255, %258 : vector<2x8x8xf32>
    %260 = math.exp %259 : vector<2x8x8xf32>
    %cst_98 = arith.constant dense<0.000000e+00> : vector<2x8xf32>
    %261 = vector.multi_reduction <add>, %260, %cst_98 [2] : vector<2x8x8xf32> to vector<2x8xf32>
    %262 = vector.shape_cast %261 : vector<2x8xf32> to vector<2x8x1xf32>
    %263 = tpu.reciprocal %262 {approx = true} : vector<2x8x1xf32> -> vector<2x8x1xf32>
    %264 = vector.broadcast %263 : vector<2x8x1xf32> to vector<2x8x8xf32>
    %265 = arith.mulf %260, %264 : vector<2x8x8xf32>
    %266 = vector.extract_strided_slice %187 {offsets = [0, 0, 24], sizes = [2, 8, 8], strides = [1, 1, 1]} : vector<2x8x32xf32> to vector<2x8x8xf32>
    "tpu.trace_start"() <{level = 10 : i32, message = "bqk,bkd->bqd"}> : () -> ()
    %cst_99 = arith.constant dense<0.000000e+00> : vector<2x8x8xf32>
    %267 = tpu.matmul %265, %266, %cst_99 {dimension_numbers = #tpu.dot_dimension_numbers<[2], [1], [1], [2], [0, 0, 0, 1, 1, 2], [0], [0]>} : vector<2x8x8xf32>, vector<2x8x8xf32>, vector<2x8x8xf32> -> vector<2x8x8xf32>
    "tpu.trace_stop"() : () -> ()
    %268 = tpu.concatenate %207, %227, %247, %267 in 2 : vector<2x8x8xf32>, vector<2x8x8xf32>, vector<2x8x8xf32>, vector<2x8x8xf32> -> vector<2x8x32xf32>
    %269 = vector.shape_cast %268 : vector<2x8x32xf32> to vector<16x32xf32>
    %c1_100 = arith.constant 1 : index
    %c0_101 = arith.constant 0 : index
    %c0_102 = arith.constant 0 : index
    %270 = vector.load %arg4[%c1_100, %c0_101, %c0_102] : memref<2x32x32xf32, #tpu.memory_space<vmem>>, vector<1x32x32xf32>
    %271 = vector.shape_cast %270 : vector<1x32x32xf32> to vector<32x32xf32>
    %cst_103 = arith.constant dense<0.000000e+00> : vector<16x32xf32>
    %272 = tpu.matmul %269, %271, %cst_103 {dimension_numbers = #tpu.dot_dimension_numbers<[1], [0], [0], [1], [0, 0, 1, 1], [], []>} : vector<16x32xf32>, vector<32x32xf32>, vector<16x32xf32> -> vector<16x32xf32>
    %c1_104 = arith.constant 1 : index
    %c0_105 = arith.constant 0 : index
    %c0_106 = arith.constant 0 : index
    %273 = vector.load %arg5[%c1_104, %c0_105, %c0_106] : memref<2x1x32xf32, #tpu.memory_space<vmem>>, vector<1x1x32xf32>
    %274 = vector.shape_cast %273 : vector<1x1x32xf32> to vector<1x32xf32>
    %275 = vector.broadcast %274 : vector<1x32xf32> to vector<16x32xf32>
    %276 = arith.addf %272, %275 : vector<16x32xf32>
    %277 = arith.addf %176, %276 : vector<16x32xf32>
    %c1_107 = arith.constant 1 : index
    %c0_108 = arith.constant 0 : index
    %c0_109 = arith.constant 0 : index
    %278 = vector.load %arg6[%c1_107, %c0_108, %c0_109] : memref<2x1x32xf32, #tpu.memory_space<vmem>>, vector<1x1x32xf32>
    %279 = vector.shape_cast %278 : vector<1x1x32xf32> to vector<1x32xf32>
    %c1_110 = arith.constant 1 : index
    %c0_111 = arith.constant 0 : index
    %c0_112 = arith.constant 0 : index
    %280 = vector.load %arg7[%c1_110, %c0_111, %c0_112] : memref<2x1x32xf32, #tpu.memory_space<vmem>>, vector<1x1x32xf32>
    %281 = vector.shape_cast %280 : vector<1x1x32xf32> to vector<1x32xf32>
    %cst_113 = arith.constant dense<0.000000e+00> : vector<16xf32>
    %282 = vector.multi_reduction <add>, %277, %cst_113 [1] : vector<16x32xf32> to vector<16xf32>
    %283 = vector.shape_cast %282 : vector<16xf32> to vector<16x1xf32>
    %cst_114 = arith.constant 3.200000e+01 : f32
    %284 = vector.broadcast %cst_114 : f32 to vector<16x1xf32>
    %285 = arith.divf %283, %284 : vector<16x1xf32>
    %286 = vector.broadcast %285 : vector<16x1xf32> to vector<16x32xf32>
    %287 = arith.subf %277, %286 : vector<16x32xf32>
    %288 = arith.mulf %287, %287 : vector<16x32xf32>
    %cst_115 = arith.constant dense<0.000000e+00> : vector<16xf32>
    %289 = vector.multi_reduction <add>, %288, %cst_115 [1] : vector<16x32xf32> to vector<16xf32>
    %290 = vector.shape_cast %289 : vector<16xf32> to vector<16x1xf32>
    %cst_116 = arith.constant 3.200000e+01 : f32
    %291 = vector.broadcast %cst_116 : f32 to vector<16x1xf32>
    %292 = arith.divf %290, %291 : vector<16x1xf32>
    %293 = vector.broadcast %285 : vector<16x1xf32> to vector<16x32xf32>
    %294 = arith.subf %277, %293 : vector<16x32xf32>
    %cst_117 = arith.constant 9.99999974E-6 : f32
    %295 = vector.broadcast %cst_117 : f32 to vector<16x1xf32>
    %296 = arith.addf %292, %295 : vector<16x1xf32>
    %297 = math.rsqrt %296 : vector<16x1xf32>
    %298 = vector.broadcast %297 : vector<16x1xf32> to vector<16x32xf32>
    %299 = arith.mulf %294, %298 : vector<16x32xf32>
    %300 = vector.broadcast %279 : vector<1x32xf32> to vector<16x32xf32>
    %301 = arith.mulf %299, %300 : vector<16x32xf32>
    %302 = vector.broadcast %281 : vector<1x32xf32> to vector<16x32xf32>
    %303 = arith.addf %301, %302 : vector<16x32xf32>
    %c1_118 = arith.constant 1 : index
    %c0_119 = arith.constant 0 : index
    %c0_120 = arith.constant 0 : index
    %304 = vector.load %arg8[%c1_118, %c0_119, %c0_120] : memref<2x32x64xf32, #tpu.memory_space<vmem>>, vector<1x32x64xf32>
    %305 = vector.shape_cast %304 : vector<1x32x64xf32> to vector<32x64xf32>
    %cst_121 = arith.constant dense<0.000000e+00> : vector<16x64xf32>
    %306 = tpu.matmul %303, %305, %cst_121 {dimension_numbers = #tpu.dot_dimension_numbers<[1], [0], [0], [1], [0, 0, 1, 1], [], []>} : vector<16x32xf32>, vector<32x64xf32>, vector<16x64xf32> -> vector<16x64xf32>
    %c1_122 = arith.constant 1 : index
    %c0_123 = arith.constant 0 : index
    %c0_124 = arith.constant 0 : index
    %307 = vector.load %arg9[%c1_122, %c0_123, %c0_124] : memref<2x1x64xf32, #tpu.memory_space<vmem>>, vector<1x1x64xf32>
    %308 = vector.shape_cast %307 : vector<1x1x64xf32> to vector<1x64xf32>
    %309 = vector.broadcast %308 : vector<1x64xf32> to vector<16x64xf32>
    %310 = arith.addf %306, %309 : vector<16x64xf32>
    %cst_125 = arith.constant 0.000000e+00 : f32
    %311 = vector.broadcast %cst_125 : f32 to vector<16x64xf32>
    %312 = arith.maximumf %310, %311 : vector<16x64xf32>
    %c1_126 = arith.constant 1 : index
    %c0_127 = arith.constant 0 : index
    %c0_128 = arith.constant 0 : index
    %313 = vector.load %arg10[%c1_126, %c0_127, %c0_128] : memref<2x64x32xf32, #tpu.memory_space<vmem>>, vector<1x64x32xf32>
    %314 = vector.shape_cast %313 : vector<1x64x32xf32> to vector<64x32xf32>
    %cst_129 = arith.constant dense<0.000000e+00> : vector<16x32xf32>
    %315 = tpu.matmul %312, %314, %cst_129 {dimension_numbers = #tpu.dot_dimension_numbers<[1], [0], [0], [1], [0, 0, 1, 1], [], []>} : vector<16x64xf32>, vector<64x32xf32>, vector<16x32xf32> -> vector<16x32xf32>
    %c1_130 = arith.constant 1 : index
    %c0_131 = arith.constant 0 : index
    %c0_132 = arith.constant 0 : index
    %316 = vector.load %arg11[%c1_130, %c0_131, %c0_132] : memref<2x1x32xf32, #tpu.memory_space<vmem>>, vector<1x1x32xf32>
    %317 = vector.shape_cast %316 : vector<1x1x32xf32> to vector<1x32xf32>
    %318 = vector.broadcast %317 : vector<1x32xf32> to vector<16x32xf32>
    %319 = arith.addf %315, %318 : vector<16x32xf32>
    %320 = arith.addf %303, %319 : vector<16x32xf32>
    %c1_133 = arith.constant 1 : index
    %c0_134 = arith.constant 0 : index
    %c0_135 = arith.constant 0 : index
    %321 = vector.load %arg12[%c1_133, %c0_134, %c0_135] : memref<2x1x32xf32, #tpu.memory_space<vmem>>, vector<1x1x32xf32>
    %322 = vector.shape_cast %321 : vector<1x1x32xf32> to vector<1x32xf32>
    %c1_136 = arith.constant 1 : index
    %c0_137 = arith.constant 0 : index
    %c0_138 = arith.constant 0 : index
    %323 = vector.load %arg13[%c1_136, %c0_137, %c0_138] : memref<2x1x32xf32, #tpu.memory_space<vmem>>, vector<1x1x32xf32>
    %324 = vector.shape_cast %323 : vector<1x1x32xf32> to vector<1x32xf32>
    %cst_139 = arith.constant dense<0.000000e+00> : vector<16xf32>
    %325 = vector.multi_reduction <add>, %320, %cst_139 [1] : vector<16x32xf32> to vector<16xf32>
    %326 = vector.shape_cast %325 : vector<16xf32> to vector<16x1xf32>
    %cst_140 = arith.constant 3.200000e+01 : f32
    %327 = vector.broadcast %cst_140 : f32 to vector<16x1xf32>
    %328 = arith.divf %326, %327 : vector<16x1xf32>
    %329 = vector.broadcast %328 : vector<16x1xf32> to vector<16x32xf32>
    %330 = arith.subf %320, %329 : vector<16x32xf32>
    %331 = arith.mulf %330, %330 : vector<16x32xf32>
    %cst_141 = arith.constant dense<0.000000e+00> : vector<16xf32>
    %332 = vector.multi_reduction <add>, %331, %cst_141 [1] : vector<16x32xf32> to vector<16xf32>
    %333 = vector.shape_cast %332 : vector<16xf32> to vector<16x1xf32>
    %cst_142 = arith.constant 3.200000e+01 : f32
    %334 = vector.broadcast %cst_142 : f32 to vector<16x1xf32>
    %335 = arith.divf %333, %334 : vector<16x1xf32>
    %336 = vector.broadcast %328 : vector<16x1xf32> to vector<16x32xf32>
    %337 = arith.subf %320, %336 : vector<16x32xf32>
    %cst_143 = arith.constant 9.99999974E-6 : f32
    %338 = vector.broadcast %cst_143 : f32 to vector<16x1xf32>
    %339 = arith.addf %335, %338 : vector<16x1xf32>
    %340 = math.rsqrt %339 : vector<16x1xf32>
    %341 = vector.broadcast %340 : vector<16x1xf32> to vector<16x32xf32>
    %342 = arith.mulf %337, %341 : vector<16x32xf32>
    %343 = vector.broadcast %322 : vector<1x32xf32> to vector<16x32xf32>
    %344 = arith.mulf %342, %343 : vector<16x32xf32>
    %345 = vector.broadcast %324 : vector<1x32xf32> to vector<16x32xf32>
    %346 = arith.addf %344, %345 : vector<16x32xf32>
    %347 = vector.shape_cast %346 : vector<16x32xf32> to vector<2x8x32xf32>
    %348 = vector.extract_strided_slice %347 {offsets = [0, 0, 0], sizes = [1, 8, 32], strides = [1, 1, 1]} : vector<2x8x32xf32> to vector<1x8x32xf32>
    %349 = vector.shape_cast %348 : vector<1x8x32xf32> to vector<8x32xf32>
    %350 = vector.shape_cast %349 : vector<8x32xf32> to vector<8x1x32xf32>
    %c0_144 = arith.constant 0 : index
    %c0_145 = arith.constant 0 : index
    %c0_146 = arith.constant 0 : index
    %351 = vector.load %arg14[%c0_144, %c0_145, %c0_146] : memref<8x2x32xf32, #tpu.memory_space<vmem>>, vector<8x1x32xf32>
    tpu.vector_store %arg14[%c0_144, %c0_145, %c0_146], %350 {strides = array<i32>} : memref<8x2x32xf32, #tpu.memory_space<vmem>>, vector<8x1x32xf32>,
    %352 = vector.extract_strided_slice %347 {offsets = [1, 0, 0], sizes = [1, 8, 32], strides = [1, 1, 1]} : vector<2x8x32xf32> to vector<1x8x32xf32>
    %353 = vector.shape_cast %352 : vector<1x8x32xf32> to vector<8x32xf32>
    %354 = vector.shape_cast %353 : vector<8x32xf32> to vector<8x1x32xf32>
    %c0_147 = arith.constant 0 : index
    %c1_148 = arith.constant 1 : index
    %c0_149 = arith.constant 0 : index
    %355 = vector.load %arg14[%c0_147, %c1_148, %c0_149] : memref<8x2x32xf32, #tpu.memory_space<vmem>>, vector<8x1x32xf32>
    tpu.vector_store %arg14[%c0_147, %c1_148, %c0_149], %354 {strides = array<i32>} : memref<8x2x32xf32, #tpu.memory_space<vmem>>, vector<8x1x32xf32>,
    return
  }
}

</mosaic_0001>

<bundles_post_ra>
// kernel: tpu_custom_call.1
= control target key start
LH: loop header
LB: loop body
LE: loop exit
PB: predicated region body
PF: predicated region fallthrough
CT: control target
= control target key end

     0   :  { %19 = vsyncpa [#allocation3], 0  ;;  %s5316_s0 = inlined_call_operand.hbm [shape: f32[8,2,32], index: 0, kind: input, shape index: {}]   ;;  %s5317_s1 = inlined_call_operand.hbm [shape: f32[8,8], index: 1, kind: input, shape index: {}]   ;;  %s5318_s2 = inlined_call_operand.vmem [shape: f32[2,32,96], index: 2, kind: input, shape index: {}]   ;;  %s5319_s3 = inlined_call_operand.vmem [shape: f32[2,1,96], index: 3, kind: input, shape index: {}]   ;;  %s5320_s4 = inlined_call_operand.vmem [shape: f32[2,32,32], index: 4, kind: input, shape index: {}]   ;;  %s5321_s5 = inlined_call_operand.vmem [shape: f32[2,1,32], index: 5, kind: input, shape index: {}]   ;;  %s5322_s6 = inlined_call_operand.vmem [shape: f32[2,1,32], index: 6, kind: input, shape index: {}]   ;;  %s5323_s7 = inlined_call_operand.vmem [shape: f32[2,1,32], index: 7, kind: input, shape index: {}]   ;;  %s5324_s8 = inlined_call_operand.vmem [shape: f32[2,32,64], index: 8, kind: input, shape index: {}]   ;;  %s5325_s9 = inlined_call_operand.vmem [shape: f32[2,1,64], index: 9, kind: input, shape index: {}]   ;;  %s5326_s10 = inlined_call_operand.vmem [shape: f32[2,64,32], index: 10, kind: input, shape index: {}]   ;;  %s5327_s11 = inlined_call_operand.vmem [shape: f32[2,1,32], index: 11, kind: input, shape index: {}]   ;;  %s5328_s12 = inlined_call_operand.vmem [shape: f32[2,1,32], index: 12, kind: input, shape index: {}]   ;;  %s5329_s13 = inlined_call_operand.vmem [shape: f32[2,1,32], index: 13, kind: input, shape index: {}]   ;;  %s5330_s14 = inlined_call_operand.hbm [shape: f32[8,2,32], index: 14, kind: output, shape index: {}]  }
   0x1   :  { %20 = vsyncpa [#allocation6], 0 }
   0x2   :  { %21 = vsyncpa [#allocation4], 0  ;;  %s4616_s29 = smov [#allocation2]  }
   0x3   :  { %s27_s30 = sshll.u32 %s4616_s29, 4  ;;  %s28_s30 = int_to_ptr.vmem [resolvable:$true] %s27_s30 }
   0x4   :  { %s4558_s15 = scalar_lea.vmem %s28_s30, 256  ;;  %p4563_p1 = scmp.lt.s32.totalorder %s28_s30, %s28_s30 }
   0x5   :  { %p4559_p0 = scmp.ne.s32.totalorder %s28_s30, %s4558_s15  ;;  %p4564_p2 = scmp.lt.s32.totalorder %s4558_s15, %s4558_s15 }
   0x7   :  { %p4565_p3 = por %p4564_p2, %p4563_p1 }
   0x9   :  { %p4566_p4 = pnand %p4565_p3, %p4559_p0 }
   0xb   :  { %4569 = shalt.err (!%p4566_p4)
}
   0xc   :  { %s5331_s16 = smov 32   ;;  %s5332_s17 = smov 2  }
   0xd   :  { %33 = dma.hbm_to_vmem [thread:$0]  %s5316_s0, 256, %s28_s30, [#allocation3], %s5331_s16, %s5331_s16, %s5332_s17  }
   0xe   :  { %s4619_s20 = smov [#allocation5]  }
   0xf   :  { %s40_s21 = sshll.u32 %s4619_s20, 4  ;;  %s41_s21 = int_to_ptr.vmem [resolvable:$true] %s40_s21 }
  0x10   :  { %s4578_s22 = scalar_lea.vmem %s41_s21, 128  ;;  %p4583_p6 = scmp.lt.s32.totalorder %s41_s21, %s41_s21 }
  0x11   :  { %p4579_p5 = scmp.ne.s32.totalorder %s41_s21, %s4578_s22  ;;  %p4584_p7 = scmp.lt.s32.totalorder %s4578_s22, %s4578_s22 }
  0x13   :  { %p4585_p8 = por %p4584_p7, %p4583_p6 }
  0x15   :  { %p4586_p9 = pnand %p4585_p8, %p4579_p5 }
  0x17   :  { %4589 = shalt.err (!%p4586_p9)
}
  0x18   :  { %43 = dma.hbm_to_vmem [thread:$0]  %s5317_s1, 128, %s41_s21, [#allocation6]  }
  0x19   :  { %4610 = dma.done.wait [#allocation3], 256  }
  0x1a   :  { %4611 = vsyncadd [#allocation3], 4294967040 }
  0x1b   :  { %4612 = dma.done.wait [#allocation6], 128  }
  0x1c   :  { %4613 = vsyncadd [#allocation6], 4294967168  ;;  %v131_v0 = vld [vmem:[%s5318_s2 + $0x18] sm:$0xff]  ;;  %v130_v1 = vld [vmem:[%s5318_s2 + $0x10] sm:$0xff]  ;;  %vm92_vm0 = vcmask 1041409   ;;  %vm95_vm1 = vcmask 1042434  }
  0x1d   :  { %4183 = vmatprep.subr.mxu1 %v131_v0  ;;  %v129_v2 = vld [vmem:[%s5318_s2 + $0x8] sm:$0xff]  ;;  %v75_v3 = vld [vmem:[#allocation2] sm:$0x3]  ;;  %v76_v4 = vld [vmem:[#allocation2 + $0x2] sm:$0x3]  ;;  %vm98_vm2 = vcmask 1043459  }
  0x1e   :  { %4184 = vmatpush3.msra.mxu1 %v131_v0  ;;  %v77_v5 = vld [vmem:[#allocation2 + $0x4] sm:$0x3]  ;;  %v78_v6 = vld [vmem:[#allocation2 + $0x6] sm:$0x3]  ;;  %v79_v7 = vld [vmem:[#allocation2 + $0x8] sm:$0x3] }
  0x1f   :  { %4185 = vmatprep.subr.mxu1 %v130_v1  ;;  %v80_v8 = vld [vmem:[#allocation2 + $0xa] sm:$0x3]  ;;  %v128_v9 = vld [vmem:[%s5318_s2] sm:$0xff]  ;;  %v81_v10 = vld [vmem:[#allocation2 + $0xc] sm:$0x3]  ;;  %v91_v11 = vrot.slane %v76_v4, 7 }
  0x20   :  { %4186 = vmatpush3.msra.mxu1 %v130_v1  ;;  %v94_v12 = vrot.slane %v77_v5, 6  ;;  %v97_v13 = vrot.slane %v78_v6, 5  ;;  %v82_v14 = vld [vmem:[#allocation2 + $0xe] sm:$0x3]  ;;  %v100_v15 = vrot.slane %v79_v7, 4  ;;  %vm101_vm3 = vcmask 1044484  }
  0x21   :  { %4187 = vmatprep.subr.mxu1 %v129_v2  ;;  %vm104_vm4 = vcmask 1045509   ;;  %v113_v16 = vrot.slane %v75_v3, 1  ;;  %v93_v17 = vsel %vm92_vm0, %v91_v11, %v75_v3  ;;  %v103_v18 = vrot.slane %v80_v8, 3  ;;  %v3955_v42 = vld [vmem:[%s5319_s3] ss:$0 sm:$0xff]  ;;  %s4622_s19 = smov 96  }
  0x22   :  { %4188 = vmatpush3.msra.mxu1 %v129_v2  ;;  %v115_v19 = vrot.slane %v77_v5, 7  ;;  %v117_v20 = vrot.slane %v78_v6, 6  ;;  %v96_v21 = vsel %vm95_vm1, %v94_v12, %v93_v17  ;;  %v106_v22 = vrot.slane %v81_v10, 2  ;;  %v4783_v49 = vld [vmem:[#allocation5] sm:$0xff]  ;;  %s4623_s20 = smov 64   ;;  %s4624_s21 = smov 88  }
  0x23   :  { %4189 = vmatprep.subr.mxu1 %v128_v9  ;;  %vm107_vm5 = vcmask 1046534   ;;  %v119_v23 = vrot.slane %v79_v7, 5  ;;  %v99_v24 = vsel %vm98_vm2, %v97_v13, %v96_v21  ;;  %v109_v25 = vrot.slane %v82_v14, 1  ;;  %s4625_s22 = smov 120   ;;  %s4626_s23 = smov 56  }
  0x24   :  { %4190 = vmatpush3.msra.mxu1 %v128_v9  ;;  %v121_v26 = vrot.slane %v80_v8, 4  ;;  %v114_v27 = vsel %vm92_vm0, %v76_v4, %v113_v16  ;;  %v102_v28 = vsel %vm101_vm3, %v100_v15, %v99_v24  ;;  %vm110_vm6 = vcmask 1047559   ;;  %s4627_s24 = smov 80   ;;  %s4628_s25 = smov 112  }
  0x25   :  { %v123_v29 = vrot.slane %v81_v10, 3  ;;  %v116_v30 = vsel %vm95_vm1, %v115_v19, %v114_v27  ;;  %v105_v31 = vsel %vm104_vm4, %v103_v18, %v102_v28  ;;  %v125_v32 = vrot.slane %v82_v14, 2  ;;  %s4629_s0 = smov 48   ;;  %s4630_s26 = smov 72  }
  0x26   :  { %vm139_vm7 = vcmask 261120   ;;  %v118_v33 = vsel %vm98_vm2, %v117_v20, %v116_v30  ;;  %v108_v34 = vsel %vm107_vm5, %v106_v22, %v105_v31  ;;  %v4620_v40 = vmov 0.0   ;;  %s4631_s27 = smov 104   ;;  %s5337_s28 = smov 40  }
  0x27   :  { %v120_v35 = vsel %vm101_vm3, %v119_v23, %v118_v33  ;;  %v4744_v36 = vsel %vm110_vm6, %v109_v25, %v108_v34  ;;  %4194 = vmatprep.subr.mxu1 %v4620_v40  ;;  %4204 = vmatprep.subr.mxu0 %v4620_v40  ;;  %vm4621_vm8 = vmmov 0   ;;  %vm222_vm9 = vcmask 64512   ;;  %s5335_s29 = smov 8   ;;  %s5333_s1 = smov 16  }
  0x28   :  { %v122_v37 = vsel %vm104_vm4, %v121_v26, %v120_v35  ;;  %4191 = vmatprep.mubr.msk.f32.mxu1 %vm139_vm7, %v4744_v36  ;;  %4206 = vmatprep.mubr.msk.f32.mxu0 %vm4621_vm8, %v4620_v40  ;;  %s5339_s30 = smov 24   ;;  %vm1583_vm10 = vcmask 195584   ;;  %vm1580_vm11 = vcmask 130048   ;;  %vm1834_vm12 = vcmask 523264   ;;  %s5344_s16 = smov 24  }
  0x29   :  { %v124_v38 = vsel %vm107_vm5, %v123_v29, %v122_v37  ;;  %vm3862_vm13 = vcmask 253952  }
  0x2a   :  { %v4750_v39 = vsel %vm110_vm6, %v125_v32, %v124_v38 }
  0x2b   :  { %4192 = vmatmul.mubr.msk.f32.vlgmr.msra.gmra.mxu1 %vm139_vm7, %v4750_v39 }
  0x2c   :  { %4196 = vmatprep.mubr.msk.f32.mxu1 %vm4621_vm8, %v4620_v40 }
  0xeb   :  { %v4193_v41 = vpop.f32.mrf.mxu1 }
  0xec   :  { %v4767_v45 = vadd.f32 %v4193_v41, %v3955_v42 }
  0xed   :  { %v210_v43 = vpop.f32.mrf.mxu1 }
  0xee   :  { %v4763_v44 = vadd.f32 %v3955_v42, %v210_v43 }
  0xf0   :  { %220 = vrot.lane.b32.xlu0 %v4763_v44, %s4622_s19 }
  0xf4   :  { %298 = vrot.lane.b32.xlu0 %v4767_v45, %s4622_s19 }
 0x162   :  { %v221_v46 = vpop.permute.xlu0 %220 }
 0x163   :  { %4195 = vmatpush3.xpose.msk.msra.mxu1 %vm222_vm9, %v221_v46 }
 0x164   :  { %4199 = vmatprep.subr.mxu1 %v4620_v40 }
 0x166   :  { %4197 = vmatmul.mubr.msk.f32.vlgmr.msra.gmra.mxu1 %vm222_vm9, %v4763_v44  ;;  %v299_v47 = vpop.permute.xlu0 %298 }
 0x167   :  { %4200 = vmatpush3.xpose.msk.msra.mxu1 %vm222_vm9, %v299_v47  ;;  %4201 = vmatprep.mubr.msk.f32.mxu1 %vm4621_vm8, %v4620_v40 }
 0x168   :  { %4209 = vmatprep.subr.mxu1 %v4620_v40 }
 0x16a   :  { %4202 = vmatmul.mubr.msk.f32.vlgmr.msra.gmra.mxu1 %vm222_vm9, %v4767_v45 }
 0x16b   :  { %4211 = vmatprep.mubr.msk.f32.mxu1 %vm4621_vm8, %v4620_v40 }
 0x226   :  { %v293_v48 = vpop.f32.mrf.mxu1 }
 0x227   :  { %v374_v50 = vmul.f32 0.35355338, %v293_v48 }
 0x228   :  { %v4198_v51 = vpop.f32.mrf.mxu1 }
 0x229   :  { %v376_v52 = vadd.f32 %v374_v50, %v4783_v49 }
 0x22a   :  { %v370_v53 = vpop.f32.mrf.mxu1 }
 0x22b   :  { %v375_v54 = vmul.f32 0.35355338, %v370_v53  ;;  %v378_v55 = vsel %vm222_vm9, %v376_v52, -inf }
 0x22c   :  { %v4203_v56 = vpop.f32.mrf.mxu1  ;;  %379 = vmax.xlane.f32.xlu1 %v378_v55 }
 0x22d   :  { %v377_v57 = vadd.f32 %v375_v54, %v4783_v49 }
 0x22f   :  { %v381_v58 = vsel %vm222_vm9, %v377_v57, -inf }
 0x230   :  { %382 = vmax.xlane.f32.xlu1 %v381_v58 }
 0x241   :  { %400 = vrot.lane.b32.xlu1 %v4763_v44, %s4623_s20 }
 0x245   :  { %476 = vrot.lane.b32.xlu1 %v4767_v45, %s4623_s20 }
 0x249   :  { %554 = vrot.lane.b32.xlu1 %v4763_v44, %s4624_s21 }
 0x24d   :  { %632 = vrot.lane.b32.xlu1 %v4767_v45, %s4624_s21 }
 0x2b5   :  { %v380_v59 = vpop.xlane.xlu1 %379 }
 0x2b6   :  { %v384_v60 = vsub.f32 %v376_v52, %v380_v59 }
 0x2b8   :  { %v386_v61 = vmul.f32 1.442695, %v384_v60 }
 0x2b9   :  { %v383_v62 = vpop.xlane.xlu1 %382 }
 0x2ba   :  { %4469 = vpow2.f32 %v386_v61  ;;  %v385_v63 = vsub.f32 %v377_v57, %v383_v62 }
 0x2bc   :  { %v388_v0 = vmul.f32 1.442695, %v385_v63 }
 0x2bd   :  { %v401_v1 = vpop.permute.xlu1 %400 }
 0x2be   :  { %4471 = vpow2.f32 %v388_v0  ;;  %4205 = vmatpush3.msra.mxu0 %v401_v1 }
 0x2bf   :  { %4214 = vmatprep.subr.mxu0 %v4620_v40 }
 0x2c1   :  { %v477_v2 = vpop.permute.xlu1 %476 }
 0x2c2   :  { %4210 = vmatpush3.msra.mxu1 %v477_v2 }
 0x2c3   :  { %4219 = vmatprep.subr.mxu1 %v4620_v40 }
 0x2c5   :  { %v555_v7 = vpop.permute.xlu1 %554 }
 0x2c7   :  { %v4470_v3 = vpop.eup %4469 }
 0x2c8   :  { %v390_v4 = vsel %vm222_vm9, %v4470_v3, 0.0 }
 0x2c9   :  { %391 = vadd.xlane.f32.xlu0 %v390_v4  ;;  %v633_v8 = vpop.permute.xlu1 %632 }
 0x2cb   :  { %v4472_v5 = vpop.eup %4471 }
 0x2cc   :  { %v393_v6 = vsel %vm222_vm9, %v4472_v5, 0.0 }
 0x2cd   :  { %394 = vadd.xlane.f32.xlu1 %v393_v6 }
 0x2de   :  { %630 = vrot.lane.b32.xlu1 %v4767_v45, %s4625_s22 }
 0x2df   :  { %552 = vrot.lane.b32.xlu0 %v4763_v44, %s4625_s22 }
 0x352   :  { %v392_v9 = vpop.xlane.xlu0 %391 }
 0x353   :  { %4473 = vrcp.f32 %v392_v9 }
 0x356   :  { %v395_v10 = vpop.xlane.xlu1 %394  ;;  %v553_v15 = vpop.permute.xlu0 %552 }
 0x357   :  { %4475 = vrcp.f32 %v395_v10 }
 0x35a   :  { %v631_v16 = vpop.permute.xlu1 %630 }
 0x360   :  { %v4474_v11 = vpop.eup %4473 }
 0x361   :  { %v398_v12 = vmul.f32 %v4474_v11, %v4470_v3 }
 0x363   :  { %4207 = vmatmul.mubr.msk.f32.vlgmr.msra.gmra.mxu0 %vm222_vm9, %v398_v12 }
 0x364   :  { %v4476_v13 = vpop.eup %4475  ;;  %4215 = vmatpush3.xpose.msk.msra.mxu0 %vm222_vm9, %v555_v7  ;;  %4216 = vmatprep.mubr.msk.f32.mxu0 %vm4621_vm8, %v4620_v40 }
 0x365   :  { %v399_v14 = vmul.f32 %v4476_v13, %v4472_v5  ;;  %4224 = vmatprep.subr.mxu0 %v4620_v40 }
 0x367   :  { %4212 = vmatmul.mubr.msk.f32.vlgmr.msra.gmra.mxu1 %vm222_vm9, %v399_v14  ;;  %4217 = vmatmul.mubr.msk.f32.vlgmr.msra.gmra.mxu0 %vm222_vm9, %v553_v15 }
 0x368   :  { %4220 = vmatpush3.xpose.msk.msra.mxu1 %vm222_vm9, %v633_v8  ;;  %4221 = vmatprep.mubr.msk.f32.mxu1 %vm4621_vm8, %v4620_v40 }
 0x369   :  { %4229 = vmatprep.subr.mxu1 %v4620_v40  ;;  %4226 = vmatprep.mubr.msk.f32.mxu0 %vm4621_vm8, %v4620_v40 }
 0x36b   :  { %4222 = vmatmul.mubr.msk.f32.vlgmr.msra.gmra.mxu1 %vm222_vm9, %v631_v16 }
 0x36c   :  { %4231 = vmatprep.mubr.msk.f32.mxu1 %vm4621_vm8, %v4620_v40 }
 0x423   :  { %v4821_v17 = vpop.f32.mrf.mxu0 }
 0x425   :  { %v4208_v18 = vpop.f32.mrf.mxu0 }
 0x427   :  { %v4823_v19 = vpop.f32.mrf.mxu1  ;;  %v626_v20 = vpop.f32.mrf.mxu0 }
 0x428   :  { %v708_v21 = vmul.f32 0.35355338, %v626_v20 }
 0x429   :  { %v4213_v22 = vpop.f32.mrf.mxu1  ;;  %v4218_v23 = vpop.f32.mrf.mxu0 }
 0x42a   :  { %v710_v24 = vadd.f32 %v708_v21, %v4783_v49 }
 0x42b   :  { %v704_v25 = vpop.f32.mrf.mxu1 }
 0x42c   :  { %v709_v26 = vmul.f32 0.35355338, %v704_v25  ;;  %v712_v27 = vsel %vm222_vm9, %v710_v24, -inf }
 0x42d   :  { %713 = vmax.xlane.f32.xlu1 %v712_v27  ;;  %v4223_v28 = vpop.f32.mrf.mxu1 }
 0x42e   :  { %v711_v29 = vadd.f32 %v709_v26, %v4783_v49 }
 0x430   :  { %v715_v30 = vsel %vm222_vm9, %v711_v29, -inf }
 0x431   :  { %716 = vmax.xlane.f32.xlu0 %v715_v30 }
 0x43e   :  { %734 = vrot.lane.b32.xlu1 %v4763_v44, %s4626_s23 }
 0x442   :  { %888 = vrot.lane.b32.xlu1 %v4763_v44, %s4627_s24 }
 0x446   :  { %966 = vrot.lane.b32.xlu1 %v4767_v45, %s4627_s24 }
 0x447   :  { %810 = vrot.lane.b32.xlu0 %v4767_v45, %s4626_s23 }
 0x44b   :  { %886 = vrot.lane.b32.xlu0 %v4763_v44, %s4628_s25 }
 0x4b6   :  { %v714_v31 = vpop.xlane.xlu1 %713 }
 0x4b7   :  { %v718_v32 = vsub.f32 %v710_v24, %v714_v31 }
 0x4b9   :  { %v720_v33 = vmul.f32 1.442695, %v718_v32 }
 0x4ba   :  { %v717_v34 = vpop.xlane.xlu0 %716  ;;  %v735_v35 = vpop.permute.xlu1 %734 }
 0x4bb   :  { %4477 = vpow2.f32 %v720_v33  ;;  %v719_v37 = vsub.f32 %v711_v29, %v717_v34  ;;  %4225 = vmatpush3.msra.mxu0 %v735_v35 }
 0x4bc   :  { %4234 = vmatprep.subr.mxu0 %v4620_v40 }
 0x4bd   :  { %v722_v38 = vmul.f32 1.442695, %v719_v37 }
 0x4be   :  { %v811_v41 = vpop.permute.xlu0 %810  ;;  %v889_v48 = vpop.permute.xlu1 %888 }
 0x4bf   :  { %4479 = vpow2.f32 %v722_v38  ;;  %4230 = vmatpush3.msra.mxu1 %v811_v41 }
 0x4c0   :  { %4239 = vmatprep.subr.mxu1 %v4620_v40 }
 0x4c2   :  { %v967_v50 = vpop.permute.xlu1 %966  ;;  %v887_v57 = vpop.permute.xlu0 %886 }
 0x4c8   :  { %v4478_v42 = vpop.eup %4477 }
 0x4c9   :  { %v724_v43 = vsel %vm222_vm9, %v4478_v42, 0.0 }
 0x4ca   :  { %725 = vadd.xlane.f32.xlu1 %v724_v43 }
 0x4cc   :  { %v4480_v46 = vpop.eup %4479 }
 0x4cd   :  { %v727_v47 = vsel %vm222_vm9, %v4480_v46, 0.0 }
 0x4ce   :  { %728 = vadd.xlane.f32.xlu1 %v727_v47 }
 0x4df   :  { %964 = vrot.lane.b32.xlu1 %v4767_v45, %s4628_s25 }
 0x553   :  { %v726_v51 = vpop.xlane.xlu1 %725 }
 0x554   :  { %4481 = vrcp.f32 %v726_v51 }
 0x557   :  { %v729_v52 = vpop.xlane.xlu1 %728 }
 0x558   :  { %4483 = vrcp.f32 %v729_v52 }
 0x55b   :  { %v965_v58 = vpop.permute.xlu1 %964 }
 0x561   :  { %v4482_v53 = vpop.eup %4481 }
 0x562   :  { %v732_v54 = vmul.f32 %v4482_v53, %v4478_v42 }
 0x564   :  { %4227 = vmatmul.mubr.msk.f32.vlgmr.msra.gmra.mxu0 %vm222_vm9, %v732_v54 }
 0x565   :  { %v4484_v55 = vpop.eup %4483  ;;  %4235 = vmatpush3.xpose.msk.msra.mxu0 %vm222_vm9, %v889_v48  ;;  %4236 = vmatprep.mubr.msk.f32.mxu0 %vm4621_vm8, %v4620_v40 }
 0x566   :  { %v733_v56 = vmul.f32 %v4484_v55, %v4480_v46  ;;  %4244 = vmatprep.subr.mxu0 %v4620_v40 }
 0x568   :  { %4232 = vmatmul.mubr.msk.f32.vlgmr.msra.gmra.mxu1 %vm222_vm9, %v733_v56  ;;  %4237 = vmatmul.mubr.msk.f32.vlgmr.msra.gmra.mxu0 %vm222_vm9, %v887_v57 }
 0x569   :  { %4240 = vmatpush3.xpose.msk.msra.mxu1 %vm222_vm9, %v967_v50  ;;  %4241 = vmatprep.mubr.msk.f32.mxu1 %vm4621_vm8, %v4620_v40 }
 0x56a   :  { %4249 = vmatprep.subr.mxu1 %v4620_v40  ;;  %4246 = vmatprep.mubr.msk.f32.mxu0 %vm4621_vm8, %v4620_v40 }
 0x56c   :  { %4242 = vmatmul.mubr.msk.f32.vlgmr.msra.gmra.mxu1 %vm222_vm9, %v965_v58 }
 0x56d   :  { %4251 = vmatprep.mubr.msk.f32.mxu1 %vm4621_vm8, %v4620_v40 }
 0x624   :  { %v4861_v59 = vpop.f32.mrf.mxu0 }
 0x626   :  { %v4228_v60 = vpop.f32.mrf.mxu0 }
 0x628   :  { %v4863_v61 = vpop.f32.mrf.mxu1  ;;  %v960_v62 = vpop.f32.mrf.mxu0 }
 0x629   :  { %v1042_v63 = vmul.f32 0.35355338, %v960_v62 }
 0x62a   :  { %v4233_v0 = vpop.f32.mrf.mxu1  ;;  %v4238_v1 = vpop.f32.mrf.mxu0 }
 0x62b   :  { %v1044_v2 = vadd.f32 %v1042_v63, %v4783_v49 }
 0x62c   :  { %v1038_v3 = vpop.f32.mrf.mxu1 }
 0x62d   :  { %v1043_v4 = vmul.f32 0.35355338, %v1038_v3  ;;  %v1046_v5 = vsel %vm222_vm9, %v1044_v2, -inf }
 0x62e   :  { %1047 = vmax.xlane.f32.xlu0 %v1046_v5  ;;  %v4243_v6 = vpop.f32.mrf.mxu1 }
 0x62f   :  { %v1045_v7 = vadd.f32 %v1043_v4, %v4783_v49  ;;  %v1588_v6 = vld [vmem:[%s5320_s4 + $0x10] sm:$0xff] }
 0x631   :  { %v1049_v8 = vsel %vm222_vm9, %v1045_v7, -inf }
 0x632   :  { %1050 = vmax.xlane.f32.xlu1 %v1049_v8  ;;  %v1586_v8 = vld [vmem:[%s5320_s4] sm:$0xff] }
 0x643   :  { %1068 = vrot.lane.b32.xlu1 %v4763_v44, %s4629_s0 }
 0x644   :  { %1144 = vrot.lane.b32.xlu0 %v4767_v45, %s4629_s0 }
 0x647   :  { %1222 = vrot.lane.b32.xlu1 %v4763_v44, %s4630_s26 }
 0x64b   :  { %1300 = vrot.lane.b32.xlu1 %v4767_v45, %s4630_s26 }
 0x64f   :  { %1298 = vrot.lane.b32.xlu1 %v4767_v45, %s4631_s27 }
 0x6b7   :  { %v1048_v9 = vpop.xlane.xlu0 %1047 }
 0x6b8   :  { %v1052_v10 = vsub.f32 %v1044_v2, %v1048_v9 }
 0x6ba   :  { %v1054_v11 = vmul.f32 1.442695, %v1052_v10 }
 0x6bb   :  { %v1145_v12 = vpop.permute.xlu0 %1144  ;;  %v1051_v13 = vpop.xlane.xlu1 %1050 }
 0x6bc   :  { %4485 = vpow2.f32 %v1054_v11  ;;  %v1053_v14 = vsub.f32 %v1045_v7, %v1051_v13  ;;  %4250 = vmatpush3.msra.mxu1 %v1145_v12  ;;  %v1587_v7 = vld [vmem:[%s5320_s4 + $0x8] sm:$0xff] }
 0x6bd   :  { %4259 = vmatprep.subr.mxu1 %v4620_v40 }
 0x6be   :  { %v1056_v15 = vmul.f32 1.442695, %v1053_v14 }
 0x6bf   :  { %v1069_v16 = vpop.permute.xlu1 %1068 }
 0x6c0   :  { %4487 = vpow2.f32 %v1056_v15  ;;  %4245 = vmatpush3.msra.mxu0 %v1069_v16 }
 0x6c1   :  { %4254 = vmatprep.subr.mxu0 %v4620_v40 }
 0x6c3   :  { %v1223_v25 = vpop.permute.xlu1 %1222 }
 0x6c7   :  { %v1301_v29 = vpop.permute.xlu1 %1300 }
 0x6c9   :  { %v4486_v18 = vpop.eup %4485 }
 0x6ca   :  { %v1058_v20 = vsel %vm222_vm9, %v4486_v18, 0.0 }
 0x6cb   :  { %1059 = vadd.xlane.f32.xlu0 %v1058_v20  ;;  %v1299_v32 = vpop.permute.xlu1 %1298 }
 0x6cd   :  { %v4488_v21 = vpop.eup %4487 }
 0x6ce   :  { %v1061_v22 = vsel %vm222_vm9, %v4488_v21, 0.0 }
 0x6cf   :  { %1062 = vadd.xlane.f32.xlu0 %v1061_v22 }
 0x6e5   :  { %1220 = vrot.lane.b32.xlu0 %v4763_v44, %s4631_s27 }
 0x754   :  { %v1060_v23 = vpop.xlane.xlu0 %1059 }
 0x755   :  { %4489 = vrcp.f32 %v1060_v23 }
 0x758   :  { %v1063_v24 = vpop.xlane.xlu0 %1062 }
 0x759   :  { %4491 = vrcp.f32 %v1063_v24 }
 0x75c   :  { %v1221_v31 = vpop.permute.xlu0 %1220 }
 0x762   :  { %v4490_v26 = vpop.eup %4489 }
 0x763   :  { %v1066_v27 = vmul.f32 %v4490_v26, %v4486_v18 }
 0x765   :  { %4247 = vmatmul.mubr.msk.f32.vlgmr.msra.gmra.mxu0 %vm222_vm9, %v1066_v27 }
 0x766   :  { %v4492_v28 = vpop.eup %4491  ;;  %4255 = vmatpush3.xpose.msk.msra.mxu0 %vm222_vm9, %v1223_v25  ;;  %4256 = vmatprep.mubr.msk.f32.mxu0 %vm4621_vm8, %v4620_v40 }
 0x767   :  { %v1067_v30 = vmul.f32 %v4492_v28, %v4488_v21  ;;  %4264 = vmatprep.subr.mxu0 %v4620_v40 }
 0x769   :  { %4252 = vmatmul.mubr.msk.f32.vlgmr.msra.gmra.mxu1 %vm222_vm9, %v1067_v30  ;;  %4257 = vmatmul.mubr.msk.f32.vlgmr.msra.gmra.mxu0 %vm222_vm9, %v1221_v31 }
 0x76a   :  { %4260 = vmatpush3.xpose.msk.msra.mxu1 %vm222_vm9, %v1301_v29  ;;  %4261 = vmatprep.mubr.msk.f32.mxu1 %vm4621_vm8, %v4620_v40 }
 0x76b   :  { %4269 = vmatprep.subr.mxu1 %v4620_v40  ;;  %4266 = vmatprep.mubr.msk.f32.mxu0 %vm4621_vm8, %v4620_v40 }
 0x76d   :  { %4262 = vmatmul.mubr.msk.f32.vlgmr.msra.gmra.mxu1 %vm222_vm9, %v1299_v32 }
 0x76e   :  { %4271 = vmatprep.mubr.msk.f32.mxu1 %vm4621_vm8, %v4620_v40 }
 0x825   :  { %v1140_v33 = vpop.f32.mrf.mxu0 }
 0x827   :  { %v4248_v34 = vpop.f32.mrf.mxu0 }
 0x829   :  { %v1216_v35 = vpop.f32.mrf.mxu1  ;;  %v1294_v37 = vpop.f32.mrf.mxu0 }
 0x82a   :  { %v1376_v38 = vmul.f32 0.35355338, %v1294_v37 }
 0x82b   :  { %v4253_v41 = vpop.f32.mrf.mxu1  ;;  %v4258_v42 = vpop.f32.mrf.mxu0 }
 0x82c   :  { %v1378_v43 = vadd.f32 %v1376_v38, %v4783_v49 }
 0x82d   :  { %v1372_v46 = vpop.f32.mrf.mxu1 }
 0x82e   :  { %v1377_v47 = vmul.f32 0.35355338, %v1372_v46  ;;  %v1380_v48 = vsel %vm222_vm9, %v1378_v43, -inf }
 0x82f   :  { %1381 = vmax.xlane.f32.xlu0 %v1380_v48  ;;  %v4263_v50 = vpop.f32.mrf.mxu1  ;;  %v1727_v48 = vld [vmem:[%s5324_s8 + $0x10] sm:$0xff] }
 0x830   :  { %v1379_v51 = vadd.f32 %v1377_v47, %v4783_v49  ;;  %v1726_v50 = vld [vmem:[%s5324_s8 + $0x8] sm:$0xff] }
 0x832   :  { %v1383_v52 = vsel %vm222_vm9, %v1379_v51, -inf }
 0x833   :  { %1384 = vmax.xlane.f32.xlu1 %v1383_v52  ;;  %v1826_v52 = vld [vmem:[%s5326_s10 + $0x38] sm:$0xff] }
 0x844   :  { %1402 = vrot.lane.b32.xlu1 %v4763_v44, %s5337_s28 }
 0x848   :  { %1556 = vrot.lane.b32.xlu1 %v4861_v59, %s5335_s29 }
 0x84c   :  { %1558 = vrot.lane.b32.xlu1 %v4863_v61, %s5335_s29 }
 0x850   :  { %1566 = vrot.lane.b32.xlu1 %v1216_v35, %s5333_s1 }
 0x8b8   :  { %v1382_v53 = vpop.xlane.xlu0 %1381 }
 0x8b9   :  { %v1386_v54 = vsub.f32 %v1378_v43, %v1382_v53  ;;  %v1825_v53 = vld [vmem:[%s5326_s10 + $0x30] sm:$0xff] }
 0x8bb   :  { %v1388_v55 = vmul.f32 1.442695, %v1386_v54  ;;  %v1824_v54 = vld [vmem:[%s5326_s10 + $0x28] sm:$0xff] }
 0x8bc   :  { %v1385_v56 = vpop.xlane.xlu1 %1384 }
 0x8bd   :  { %4493 = vpow2.f32 %v1388_v55  ;;  %v1387_v57 = vsub.f32 %v1379_v51, %v1385_v56  ;;  %v1725_v51 = vld [vmem:[%s5324_s8] sm:$0xff] }
 0x8be   :  { %v1823_v55 = vld [vmem:[%s5326_s10 + $0x20] sm:$0xff] }
 0x8bf   :  { %v1390_v58 = vmul.f32 1.442695, %v1387_v57 }
 0x8c0   :  { %v1403_v60 = vpop.permute.xlu1 %1402 }
 0x8c1   :  { %4495 = vpow2.f32 %v1390_v58  ;;  %4265 = vmatpush3.msra.mxu0 %v1403_v60 }
 0x8c4   :  { %v1557_v13 = vpop.permute.xlu1 %1556 }
 0x8c5   :  { %v1578_v16 = vsel %vm222_vm9, %v4821_v17, %v1557_v13  ;;  %v3982_v17 = vld [vmem:[%s5321_s5] ss:$0 sm:$0xff] }
 0x8c8   :  { %v1559_v14 = vpop.permute.xlu1 %1558 }
 0x8c9   :  { %v1579_v23 = vsel %vm222_vm9, %v4823_v19, %v1559_v14 }
 0x8ca   :  { %v4494_v44 = vpop.eup %4493 }
 0x8cb   :  { %v1392_v62 = vsel %vm222_vm9, %v4494_v44, 0.0 }
 0x8cc   :  { %1393 = vadd.xlane.f32.xlu0 %v1392_v62  ;;  %v1567_v18 = vpop.permute.xlu1 %1566 }
 0x8cd   :  { %v1582_v24 = vsel %vm1580_vm11, %v1579_v23, %v1567_v18  ;;  %v3990_v18 = vld [vmem:[%s5327_s11] ss:$0 sm:$0xff] }
 0x8ce   :  { %v4496_v59 = vpop.eup %4495 }
 0x8cf   :  { %v1395_v61 = vsel %vm222_vm9, %v4496_v59, 0.0 }
 0x8d0   :  { %1396 = vadd.xlane.f32.xlu0 %v1395_v61  ;;  %v3985_v61 = vld [vmem:[%s5322_s6] ss:$0 sm:$0xff] }
 0x8e6   :  { %1478 = vrot.lane.b32.xlu0 %v4767_v45, %s5337_s28  ;;  %v1589_v45 = vld [vmem:[%s5320_s4 + $0x18] sm:$0xff] }
 0x8e7   :  { %4274 = vmatprep.subr.mxu0 %v1589_v45 }
 0x8ea   :  { %1564 = vrot.lane.b32.xlu0 %v1140_v33, %s5333_s1 }
 0x955   :  { %v1394_v63 = vpop.xlane.xlu0 %1393 }
 0x956   :  { %4497 = vrcp.f32 %v1394_v63 }
 0x959   :  { %v1397_v0 = vpop.xlane.xlu0 %1396 }
 0x95a   :  { %4499 = vrcp.f32 %v1397_v0  ;;  %v3986_v0 = vld [vmem:[%s5323_s7] ss:$0 sm:$0xff] }
 0x95d   :  { %v1479_v1 = vpop.permute.xlu0 %1478 }
 0x95e   :  { %4270 = vmatpush3.msra.mxu1 %v1479_v1 }
 0x961   :  { %v1565_v15 = vpop.permute.xlu0 %1564 }
 0x962   :  { %v1581_v20 = vsel %vm1580_vm11, %v1578_v16, %v1565_v15 }
 0x963   :  { %v4498_v2 = vpop.eup %4497 }
 0x964   :  { %v1400_v3 = vmul.f32 %v4498_v2, %v4494_v44 }
 0x966   :  { %4267 = vmatmul.mubr.msk.f32.vlgmr.msra.gmra.mxu0 %vm222_vm9, %v1400_v3 }
 0x967   :  { %v4500_v4 = vpop.eup %4499  ;;  %4275 = vmatpush3.msra.mxu0 %v1589_v45 }
 0x968   :  { %v1401_v5 = vmul.f32 %v4500_v4, %v4496_v59  ;;  %4276 = vmatprep.subr.mxu0 %v1588_v6 }
 0x969   :  { %4277 = vmatpush3.msra.mxu0 %v1588_v6  ;;  %v1822_v6 = vld [vmem:[%s5326_s10 + $0x18] sm:$0xff] }
 0x96a   :  { %4272 = vmatmul.mubr.msk.f32.vlgmr.msra.gmra.mxu1 %vm222_vm9, %v1401_v5  ;;  %4278 = vmatprep.subr.mxu0 %v1587_v7 }
 0x96b   :  { %4279 = vmatpush3.msra.mxu0 %v1587_v7  ;;  %v1821_v7 = vld [vmem:[%s5326_s10 + $0x10] sm:$0xff] }
 0x96c   :  { %4280 = vmatprep.subr.mxu0 %v1586_v8 }
 0x96d   :  { %4281 = vmatpush3.msra.mxu0 %v1586_v8  ;;  %v1820_v8 = vld [vmem:[%s5326_s10 + $0x8] sm:$0xff] }
 0x96e   :  { %4296 = vmatprep.subr.mxu0 %v1826_v52 }
 0xa26   :  { %v1474_v9 = vpop.f32.mrf.mxu0 }
 0xa27   :  { %1572 = vrot.lane.b32.xlu0 %v1474_v9, %s5339_s30  ;;  %v1819_v9 = vld [vmem:[%s5326_s10] sm:$0xff] }
 0xa28   :  { %v4268_v10 = vpop.f32.mrf.mxu0 }
 0xa29   :  { %v3987_v10 = vld [vmem:[%s5325_s9] ss:$0 sm:$0xff] }
 0xa2a   :  { %v1550_v11 = vpop.f32.mrf.mxu1 }
 0xa2b   :  { %1574 = vrot.lane.b32.xlu1 %v1550_v11, %s5339_s30 }
 0xa2c   :  { %v4273_v12 = vpop.f32.mrf.mxu1 }
 0xa99   :  { %v1573_v21 = vpop.permute.xlu0 %1572 }
 0xa9a   :  { %v1584_v22 = vsel %vm1583_vm10, %v1581_v20, %v1573_v21 }
 0xa9b   :  { %4282 = vmatprep.mubr.msk.f32.mxu0 %vm139_vm7, %v1584_v22 }
 0xa9d   :  { %v1575_v25 = vpop.permute.xlu1 %1574 }
 0xa9e   :  { %v1585_v26 = vsel %vm1583_vm10, %v1582_v24, %v1575_v25 }
 0xa9f   :  { %4283 = vmatmul.mubr.msk.f32.vlgmr.msra.gmra.mxu0 %vm139_vm7, %v1585_v26 }
 0xaa0   :  { %4297 = vmatpush3.msra.mxu0 %v1826_v52 }
 0xaa1   :  { %4298 = vmatprep.subr.mxu0 %v1825_v53 }
 0xaa2   :  { %4299 = vmatpush3.msra.mxu0 %v1825_v53 }
 0xaa3   :  { %4300 = vmatprep.subr.mxu0 %v1824_v54 }
 0xaa4   :  { %4301 = vmatpush3.msra.mxu0 %v1824_v54 }
 0xaa5   :  { %4302 = vmatprep.subr.mxu0 %v1823_v55 }
 0xaa6   :  { %4303 = vmatpush3.msra.mxu0 %v1823_v55 }
 0xaa7   :  { %4304 = vmatprep.subr.mxu0 %v1822_v6 }
 0xaa8   :  { %4305 = vmatpush3.msra.mxu0 %v1822_v6 }
 0xaa9   :  { %4306 = vmatprep.subr.mxu0 %v1821_v7 }
 0xaaa   :  { %4307 = vmatpush3.msra.mxu0 %v1821_v7 }
 0xaab   :  { %4308 = vmatprep.subr.mxu0 %v1820_v8 }
 0xaac   :  { %4309 = vmatpush3.msra.mxu0 %v1820_v8 }
 0xaad   :  { %4310 = vmatprep.subr.mxu0 %v1819_v9 }
 0xaae   :  { %4311 = vmatpush3.msra.mxu0 %v1819_v9 }
 0xaaf   :  { %4336 = vmatprep.subr.mxu0 %v4620_v40 }
 0xb5f   :  { %v4284_v27 = vpop.f32.mrf.mxu0 }
 0xb60   :  { %v1675_v28 = vadd.f32 %v4284_v27, %v3982_v17 }
 0xb61   :  { %v1669_v29 = vpop.f32.mrf.mxu0 }
 0xb62   :  { %v1670_v30 = vadd.f32 %v3982_v17, %v1669_v29  ;;  %v1679_v31 = vadd.f32 %v1675_v28, %v4750_v39 }
 0xb64   :  { %v1685_v32 = vsel %vm139_vm7, %v1679_v31, 0.0  ;;  %v1678_v19 = vadd.f32 %v1670_v30, %v4744_v36  ;;  %v1728_v36 = vld [vmem:[%s5324_s8 + $0x18] sm:$0xff] }
 0xb65   :  { %1686 = vadd.xlane.f32.xlu1 %v1685_v32  ;;  %4285 = vmatprep.subr.mxu1 %v1728_v36 }
 0xb66   :  { %v1682_v33 = vsel %vm139_vm7, %v1678_v19, 0.0  ;;  %4286 = vmatpush3.msra.mxu1 %v1728_v36 }
 0xb67   :  { %1683 = vadd.xlane.f32.xlu0 %v1682_v33  ;;  %4287 = vmatprep.subr.mxu1 %v1727_v48 }
 0xb68   :  { %4288 = vmatpush3.msra.mxu1 %v1727_v48 }
 0xb69   :  { %4289 = vmatprep.subr.mxu1 %v1726_v50 }
 0xb6a   :  { %4290 = vmatpush3.msra.mxu1 %v1726_v50 }
 0xb6b   :  { %4291 = vmatprep.subr.mxu1 %v1725_v51 }
 0xb6c   :  { %4292 = vmatpush3.msra.mxu1 %v1725_v51  ;;  %v3993_v51 = vld [vmem:[%s5328_s12] ss:$0 sm:$0xff] }
 0xbee   :  { %v1687_v34 = vpop.xlane.xlu1 %1686 }
 0xbef   :  { %v1690_v35 = vmul.f32 0.03125, %v1687_v34 }
 0xbf0   :  { %v1684_v37 = vpop.xlane.xlu0 %1683 }
 0xbf1   :  { %v1689_v38 = vmul.f32 0.03125, %v1684_v37  ;;  %v1692_v41 = vsub.f32 %v1679_v31, %v1690_v35  ;;  %v3998_v37 = vld [vmem:[%s5318_s2 + $0x38] sm:$0xff] }
 0xbf2   :  { %4315 = vmatprep.subr.mxu1 %v3998_v37 }
 0xbf3   :  { %v1691_v42 = vsub.f32 %v1678_v19, %v1689_v38  ;;  %v1694_v47 = vmul.f32 %v1692_v41, %v1692_v41  ;;  %v3997_v38 = vld [vmem:[%s5318_s2 + $0x30] sm:$0xff] }
 0xbf5   :  { %v1693_v43 = vmul.f32 %v1691_v42, %v1691_v42  ;;  %v1698_v39 = vsel %vm139_vm7, %v1694_v47, 0.0 }
 0xbf7   :  { %v1695_v46 = vsel %vm139_vm7, %v1693_v43, 0.0 }
 0xbf8   :  { %1696 = vadd.xlane.f32.xlu0 %v1695_v46 }
 0xbfc   :  { %1699 = vadd.xlane.f32.xlu0 %v1698_v39 }
 0xc81   :  { %v1697_v56 = vpop.xlane.xlu0 %1696 }
 0xc82   :  { %v1701_v57 = vmul.f32 0.03125, %v1697_v56  ;;  %v3994_v56 = vld [vmem:[%s5329_s13] ss:$0 sm:$0xff] }
 0xc84   :  { %v1703_v58 = vadd.f32 1e-05, %v1701_v57 }
 0xc85   :  { %v1700_v60 = vpop.xlane.xlu0 %1699 }
 0xc86   :  { %4501 = vrsqrt.f32 %v1703_v58  ;;  %v1702_v44 = vmul.f32 0.03125, %v1700_v60 }
 0xc88   :  { %v1704_v62 = vadd.f32 1e-05, %v1702_v44  ;;  %v4000_v44 = vld [vmem:[%s5319_s3 + $0x1] ss:$0 sm:$0xff]  ;;  %s5341_s3 = smov 40  }
 0xc8a   :  { %4503 = vrsqrt.f32 %v1704_v62 }
 0xc93   :  { %v4502_v59 = vpop.eup %4501 }
 0xc94   :  { %v1707_v63 = vmul.f32 %v4502_v59, %v1691_v42  ;;  %v3995_v42 = vld [vmem:[%s5318_s2 + $0x20] sm:$0xff] }
 0xc96   :  { %v1715_v1 = vmul.f32 %v3985_v61, %v1707_v63 }
 0xc97   :  { %v4504_v2 = vpop.eup %4503 }
 0xc98   :  { %v1708_v3 = vmul.f32 %v4504_v2, %v1692_v41  ;;  %v1723_v4 = vadd.f32 %v3986_v0, %v1715_v1  ;;  %v3996_v41 = vld [vmem:[%s5318_s2 + $0x28] sm:$0xff] }
 0xc9a   :  { %v1716_v5 = vmul.f32 %v3985_v61, %v1708_v3  ;;  %4293 = vmatprep.mubr.msk.f32.mxu1 %vm139_vm7, %v1723_v4 }
 0xc9c   :  { %v1724_v45 = vadd.f32 %v3986_v0, %v1716_v5 }
 0xc9e   :  { %4294 = vmatmul.mubr.msk.f32.vlgmr.msra.gmra.mxu1 %vm139_vm7, %v1724_v45 }
 0xc9f   :  { %4316 = vmatpush3.msra.mxu1 %v3998_v37 }
 0xca0   :  { %4317 = vmatprep.subr.mxu1 %v3997_v38 }
 0xca1   :  { %4318 = vmatpush3.msra.mxu1 %v3997_v38 }
 0xca2   :  { %4319 = vmatprep.subr.mxu1 %v3996_v41 }
 0xca3   :  { %4320 = vmatpush3.msra.mxu1 %v3996_v41 }
 0xca4   :  { %4321 = vmatprep.subr.mxu1 %v3995_v42 }
 0xca5   :  { %4322 = vmatpush3.msra.mxu1 %v3995_v42  ;;  %v5103_v42 = vld [vmem:[#allocation5] sm:$0xff] }
 0xca6   :  { %4326 = vmatprep.subr.mxu1 %v4620_v40 }
 0xd5e   :  { %v4295_v11 = vpop.f32.mrf.mxu1 }
 0xd5f   :  { %v1814_v12 = vadd.f32 %v4295_v11, %v3987_v10 }
 0xd60   :  { %v1808_v13 = vpop.f32.mrf.mxu1 }
 0xd61   :  { %v1809_v14 = vadd.f32 %v3987_v10, %v1808_v13  ;;  %v1818_v16 = vmax.f32 %v1814_v12, 0.0 }
 0xd63   :  { %v1817_v15 = vmax.f32 %v1809_v14, 0.0 }
 0xd65   :  { %4312 = vmatprep.mubr.msk.f32.mxu0 %vm1834_vm12, %v1817_v15 }
 0xd66   :  { %4313 = vmatmul.mubr.msk.f32.vlgmr.msra.gmra.mxu0 %vm1834_vm12, %v1818_v16 }
 0xd67   :  { %4338 = vmatprep.mubr.msk.f32.mxu0 %vm4621_vm8, %v4620_v40 }
 0xe26   :  { %v4314_v20 = vpop.f32.mrf.mxu0 }
 0xe27   :  { %v1913_v21 = vadd.f32 %v4314_v20, %v3990_v18 }
 0xe28   :  { %v1907_v22 = vpop.f32.mrf.mxu0 }
 0xe29   :  { %v1908_v23 = vadd.f32 %v3990_v18, %v1907_v22  ;;  %v1917_v24 = vadd.f32 %v1913_v21, %v1724_v45 }
 0xe2b   :  { %v1923_v25 = vsel %vm139_vm7, %v1917_v24, 0.0  ;;  %v1916_v26 = vadd.f32 %v1908_v23, %v1723_v4 }
 0xe2c   :  { %1924 = vadd.xlane.f32.xlu0 %v1923_v25 }
 0xe2d   :  { %v1920_v17 = vsel %vm139_vm7, %v1916_v26, 0.0 }
 0xe2e   :  { %1921 = vadd.xlane.f32.xlu1 %v1920_v17 }
 0xeb5   :  { %v1925_v27 = vpop.xlane.xlu0 %1924 }
 0xeb6   :  { %v1927_v28 = vmul.f32 0.03125, %v1925_v27 }
 0xeb7   :  { %v1922_v29 = vpop.xlane.xlu1 %1921 }
 0xeb8   :  { %v1929_v30 = vsub.f32 %v1917_v24, %v1927_v28  ;;  %v1926_v31 = vmul.f32 0.03125, %v1922_v29 }
 0xeba   :  { %v1928_v32 = vsub.f32 %v1916_v26, %v1926_v31  ;;  %v1931_v19 = vmul.f32 %v1929_v30, %v1929_v30 }
 0xebc   :  { %v1935_v33 = vsel %vm139_vm7, %v1931_v19, 0.0  ;;  %v1930_v34 = vmul.f32 %v1928_v32, %v1928_v32 }
 0xebd   :  { %1936 = vadd.xlane.f32.xlu0 %v1935_v33 }
 0xebe   :  { %v1932_v35 = vsel %vm139_vm7, %v1930_v34, 0.0 }
 0xebf   :  { %1933 = vadd.xlane.f32.xlu1 %v1932_v35 }
 0xf46   :  { %v1937_v43 = vpop.xlane.xlu0 %1936 }
 0xf47   :  { %v1939_v46 = vmul.f32 0.03125, %v1937_v43 }
 0xf48   :  { %v1934_v47 = vpop.xlane.xlu1 %1933 }
 0xf49   :  { %v1941_v39 = vadd.f32 1e-05, %v1939_v46  ;;  %v1938_v36 = vmul.f32 0.03125, %v1934_v47 }
 0xf4b   :  { %4505 = vrsqrt.f32 %v1941_v39  ;;  %v1940_v48 = vadd.f32 1e-05, %v1938_v36 }
 0xf4d   :  { %4507 = vrsqrt.f32 %v1940_v48 }
 0xf58   :  { %v4506_v50 = vpop.eup %4505 }
 0xf59   :  { %v1945_v52 = vmul.f32 %v4506_v50, %v1929_v30 }
 0xf5a   :  { %v4508_v53 = vpop.eup %4507 }
 0xf5b   :  { %v1944_v54 = vmul.f32 %v4508_v53, %v1928_v32  ;;  %v1953_v55 = vmul.f32 %v3993_v51, %v1945_v52 }
 0xf5d   :  { %v1952_v57 = vmul.f32 %v3993_v51, %v1944_v54  ;;  %v5032_v60 = vadd.f32 %v3994_v56, %v1953_v55 }
 0xf5f   :  { %v5030_v58 = vadd.f32 %v3994_v56, %v1952_v57 }
 0xf61   :  { %4323 = vmatprep.mubr.msk.f32.mxu1 %vm139_vm7, %v5030_v58 }
 0xf62   :  { %4324 = vmatmul.mubr.msk.f32.vlgmr.msra.gmra.mxu1 %vm139_vm7, %v5032_v60 }
 0xf63   :  { %4328 = vmatprep.mubr.msk.f32.mxu1 %vm4621_vm8, %v4620_v40 }
0x1022   :  { %v4325_v62 = vpop.f32.mrf.mxu1 }
0x1023   :  { %v5043_v59 = vadd.f32 %v4325_v62, %v4000_v44 }
0x1024   :  { %v2047_v61 = vpop.f32.mrf.mxu1 }
0x1025   :  { %v5045_v63 = vadd.f32 %v4000_v44, %v2047_v61  ;;  %2134 = vrot.lane.b32.xlu0 %v5043_v59, %s4622_s19 }
0x1027   :  { %2057 = vrot.lane.b32.xlu1 %v5045_v63, %s4622_s19  ;;  %s5342_s19 = smov 8  }
0x1097   :  { %v2135_v1 = vpop.permute.xlu0 %2134 }
0x1099   :  { %v2058_v0 = vpop.permute.xlu1 %2057 }
0x109a   :  { %4327 = vmatpush3.xpose.msk.msra.mxu1 %vm222_vm9, %v2058_v0 }
0x109b   :  { %4331 = vmatprep.subr.mxu1 %v4620_v40 }
0x109d   :  { %4329 = vmatmul.mubr.msk.f32.vlgmr.msra.gmra.mxu1 %vm222_vm9, %v5045_v63 }
0x109e   :  { %4332 = vmatpush3.xpose.msk.msra.mxu1 %vm222_vm9, %v2135_v1  ;;  %4333 = vmatprep.mubr.msk.f32.mxu1 %vm4621_vm8, %v4620_v40 }
0x109f   :  { %4341 = vmatprep.subr.mxu1 %v4620_v40 }
0x10a1   :  { %4334 = vmatmul.mubr.msk.f32.vlgmr.msra.gmra.mxu1 %vm222_vm9, %v5043_v59 }
0x10a2   :  { %4343 = vmatprep.mubr.msk.f32.mxu1 %vm4621_vm8, %v4620_v40 }
0x115d   :  { %v2129_v2 = vpop.f32.mrf.mxu1 }
0x115e   :  { %v2210_v3 = vmul.f32 0.35355338, %v2129_v2 }
0x115f   :  { %v4330_v4 = vpop.f32.mrf.mxu1 }
0x1160   :  { %v2212_v5 = vadd.f32 %v2210_v3, %v4783_v49 }
0x1161   :  { %v2206_v45 = vpop.f32.mrf.mxu1 }
0x1162   :  { %v2211_v6 = vmul.f32 0.35355338, %v2206_v45  ;;  %v2214_v7 = vsel %vm222_vm9, %v2212_v5, -inf }
0x1163   :  { %2215 = vmax.xlane.f32.xlu1 %v2214_v7  ;;  %v4335_v8 = vpop.f32.mrf.mxu1 }
0x1164   :  { %v2213_v9 = vadd.f32 %v2211_v6, %v4783_v49 }
0x1166   :  { %v2217_v10 = vsel %vm222_vm9, %v2213_v9, -inf }
0x1167   :  { %2218 = vmax.xlane.f32.xlu0 %v2217_v10 }
0x1174   :  { %2236 = vrot.lane.b32.xlu1 %v5045_v63, %s4623_s20 }
0x1178   :  { %2390 = vrot.lane.b32.xlu1 %v5045_v63, %s4624_s21 }
0x117c   :  { %2468 = vrot.lane.b32.xlu1 %v5043_v59, %s4624_s21 }
0x117d   :  { %2312 = vrot.lane.b32.xlu0 %v5043_v59, %s4623_s20  ;;  %s5343_s20 = smov 16  }
0x11ec   :  { %v2216_v11 = vpop.xlane.xlu1 %2215 }
0x11ed   :  { %v2220_v12 = vsub.f32 %v2212_v5, %v2216_v11 }
0x11ef   :  { %v2222_v13 = vmul.f32 1.442695, %v2220_v12 }
0x11f0   :  { %v2237_v14 = vpop.permute.xlu1 %2236  ;;  %v2219_v49 = vpop.xlane.xlu0 %2218 }
0x11f1   :  { %4509 = vpow2.f32 %v2222_v13  ;;  %v2221_v15 = vsub.f32 %v2213_v9, %v2219_v49  ;;  %4337 = vmatpush3.msra.mxu0 %v2237_v14 }
0x11f2   :  { %4346 = vmatprep.subr.mxu0 %v4620_v40 }
0x11f3   :  { %v2224_v16 = vmul.f32 1.442695, %v2221_v15 }
0x11f4   :  { %v2313_v18 = vpop.permute.xlu0 %2312  ;;  %v2391_v24 = vpop.permute.xlu1 %2390 }
0x11f5   :  { %4511 = vpow2.f32 %v2224_v16  ;;  %4342 = vmatpush3.msra.mxu1 %v2313_v18 }
0x11f6   :  { %4351 = vmatprep.subr.mxu1 %v4620_v40 }
0x11f8   :  { %v2469_v25 = vpop.permute.xlu1 %2468 }
0x11fe   :  { %v4510_v20 = vpop.eup %4509 }
0x11ff   :  { %v2226_v21 = vsel %vm222_vm9, %v4510_v20, 0.0 }
0x1200   :  { %2227 = vadd.xlane.f32.xlu1 %v2226_v21 }
0x1202   :  { %v4512_v22 = vpop.eup %4511 }
0x1203   :  { %v2229_v23 = vsel %vm222_vm9, %v4512_v22, 0.0 }
0x1204   :  { %2230 = vadd.xlane.f32.xlu0 %v2229_v23 }
0x1211   :  { %2466 = vrot.lane.b32.xlu1 %v5043_v59, %s4625_s22 }
0x121a   :  { %2388 = vrot.lane.b32.xlu0 %v5045_v63, %s4625_s22 }
0x1289   :  { %v2228_v26 = vpop.xlane.xlu1 %2227 }
0x128a   :  { %4513 = vrcp.f32 %v2228_v26 }
0x128d   :  { %v2231_v17 = vpop.xlane.xlu0 %2230  ;;  %v2467_v32 = vpop.permute.xlu1 %2466 }
0x128e   :  { %4515 = vrcp.f32 %v2231_v17 }
0x1291   :  { %v2389_v31 = vpop.permute.xlu0 %2388 }
0x1297   :  { %v4514_v27 = vpop.eup %4513 }
0x1298   :  { %v2234_v28 = vmul.f32 %v4514_v27, %v4510_v20 }
0x129a   :  { %4339 = vmatmul.mubr.msk.f32.vlgmr.msra.gmra.mxu0 %vm222_vm9, %v2234_v28 }
0x129b   :  { %v4516_v29 = vpop.eup %4515  ;;  %4347 = vmatpush3.xpose.msk.msra.mxu0 %vm222_vm9, %v2391_v24  ;;  %4348 = vmatprep.mubr.msk.f32.mxu0 %vm4621_vm8, %v4620_v40 }
0x129c   :  { %v2235_v30 = vmul.f32 %v4516_v29, %v4512_v22  ;;  %4356 = vmatprep.subr.mxu0 %v4620_v40 }
0x129e   :  { %4344 = vmatmul.mubr.msk.f32.vlgmr.msra.gmra.mxu1 %vm222_vm9, %v2235_v30  ;;  %4349 = vmatmul.mubr.msk.f32.vlgmr.msra.gmra.mxu0 %vm222_vm9, %v2389_v31 }
0x129f   :  { %4352 = vmatpush3.xpose.msk.msra.mxu1 %vm222_vm9, %v2469_v25  ;;  %4353 = vmatprep.mubr.msk.f32.mxu1 %vm4621_vm8, %v4620_v40 }
0x12a0   :  { %4361 = vmatprep.subr.mxu1 %v4620_v40  ;;  %4358 = vmatprep.mubr.msk.f32.mxu0 %vm4621_vm8, %v4620_v40 }
0x12a2   :  { %4354 = vmatmul.mubr.msk.f32.vlgmr.msra.gmra.mxu1 %vm222_vm9, %v2467_v32 }
0x12a3   :  { %4363 = vmatprep.mubr.msk.f32.mxu1 %vm4621_vm8, %v4620_v40 }
0x135a   :  { %v5099_v19 = vpop.f32.mrf.mxu0 }
0x135c   :  { %v4340_v33 = vpop.f32.mrf.mxu0 }
0x135e   :  { %v5101_v34 = vpop.f32.mrf.mxu1  ;;  %v2462_v35 = vpop.f32.mrf.mxu0 }
0x135f   :  { %v2544_v37 = vmul.f32 0.35355338, %v2462_v35 }
0x1360   :  { %v4345_v38 = vpop.f32.mrf.mxu1  ;;  %v4350_v41 = vpop.f32.mrf.mxu0 }
0x1361   :  { %v2546_v43 = vadd.f32 %v5103_v42, %v2544_v37 }
0x1362   :  { %v2540_v46 = vpop.f32.mrf.mxu1 }
0x1363   :  { %v2545_v47 = vmul.f32 0.35355338, %v2540_v46  ;;  %v2548_v39 = vsel %vm222_vm9, %v2546_v43, -inf }
0x1364   :  { %2549 = vmax.xlane.f32.xlu0 %v2548_v39  ;;  %v4355_v36 = vpop.f32.mrf.mxu1 }
0x1365   :  { %v2547_v48 = vadd.f32 %v5103_v42, %v2545_v47 }
0x1367   :  { %v2551_v50 = vsel %vm222_vm9, %v2547_v48, -inf }
0x1368   :  { %2552 = vmax.xlane.f32.xlu1 %v2551_v50 }
0x1379   :  { %2570 = vrot.lane.b32.xlu1 %v5045_v63, %s4626_s23 }
0x137a   :  { %2646 = vrot.lane.b32.xlu0 %v5043_v59, %s4626_s23 }
0x137d   :  { %2724 = vrot.lane.b32.xlu1 %v5045_v63, %s4627_s24 }
0x1381   :  { %2802 = vrot.lane.b32.xlu1 %v5043_v59, %s4627_s24 }
0x1385   :  { %2800 = vrot.lane.b32.xlu1 %v5043_v59, %s4628_s25 }
0x13ed   :  { %v2550_v51 = vpop.xlane.xlu0 %2549 }
0x13ee   :  { %v2554_v52 = vsub.f32 %v2546_v43, %v2550_v51 }
0x13f0   :  { %v2556_v53 = vmul.f32 1.442695, %v2554_v52 }
0x13f1   :  { %v2647_v54 = vpop.permute.xlu0 %2646  ;;  %v2553_v55 = vpop.xlane.xlu1 %2552 }
0x13f2   :  { %4517 = vpow2.f32 %v2556_v53  ;;  %v2555_v56 = vsub.f32 %v2547_v48, %v2553_v55  ;;  %4362 = vmatpush3.msra.mxu1 %v2647_v54 }
0x13f3   :  { %4371 = vmatprep.subr.mxu1 %v4620_v40 }
0x13f4   :  { %v2558_v57 = vmul.f32 1.442695, %v2555_v56 }
0x13f5   :  { %v2571_v44 = vpop.permute.xlu1 %2570 }
0x13f6   :  { %4519 = vpow2.f32 %v2558_v57  ;;  %4357 = vmatpush3.msra.mxu0 %v2571_v44 }
0x13f7   :  { %4366 = vmatprep.subr.mxu0 %v4620_v40 }
0x13f9   :  { %v2725_v4 = vpop.permute.xlu1 %2724 }
0x13fd   :  { %v2803_v7 = vpop.permute.xlu1 %2802 }
0x13ff   :  { %v4518_v62 = vpop.eup %4517 }
0x1400   :  { %v2560_v61 = vsel %vm222_vm9, %v4518_v62, 0.0 }
0x1401   :  { %2561 = vadd.xlane.f32.xlu0 %v2560_v61  ;;  %v2801_v10 = vpop.permute.xlu1 %2800 }
0x1403   :  { %v4520_v0 = vpop.eup %4519 }
0x1404   :  { %v2563_v1 = vsel %vm222_vm9, %v4520_v0, 0.0 }
0x1405   :  { %2564 = vadd.xlane.f32.xlu0 %v2563_v1 }
0x141b   :  { %2722 = vrot.lane.b32.xlu0 %v5045_v63, %s4628_s25 }
0x148a   :  { %v2562_v2 = vpop.xlane.xlu0 %2561 }
0x148b   :  { %4521 = vrcp.f32 %v2562_v2 }
0x148e   :  { %v2565_v3 = vpop.xlane.xlu0 %2564 }
0x148f   :  { %4523 = vrcp.f32 %v2565_v3 }
0x1492   :  { %v2723_v9 = vpop.permute.xlu0 %2722 }
0x1498   :  { %v4522_v5 = vpop.eup %4521 }
0x1499   :  { %v2568_v45 = vmul.f32 %v4522_v5, %v4518_v62 }
0x149b   :  { %4359 = vmatmul.mubr.msk.f32.vlgmr.msra.gmra.mxu0 %vm222_vm9, %v2568_v45 }
0x149c   :  { %v4524_v6 = vpop.eup %4523  ;;  %4367 = vmatpush3.xpose.msk.msra.mxu0 %vm222_vm9, %v2725_v4  ;;  %4368 = vmatprep.mubr.msk.f32.mxu0 %vm4621_vm8, %v4620_v40 }
0x149d   :  { %v2569_v8 = vmul.f32 %v4524_v6, %v4520_v0  ;;  %4376 = vmatprep.subr.mxu0 %v4620_v40 }
0x149f   :  { %4364 = vmatmul.mubr.msk.f32.vlgmr.msra.gmra.mxu1 %vm222_vm9, %v2569_v8  ;;  %4369 = vmatmul.mubr.msk.f32.vlgmr.msra.gmra.mxu0 %vm222_vm9, %v2723_v9 }
0x14a0   :  { %4372 = vmatpush3.xpose.msk.msra.mxu1 %vm222_vm9, %v2803_v7  ;;  %4373 = vmatprep.mubr.msk.f32.mxu1 %vm4621_vm8, %v4620_v40 }
0x14a1   :  { %4381 = vmatprep.subr.mxu1 %v4620_v40  ;;  %4378 = vmatprep.mubr.msk.f32.mxu0 %vm4621_vm8, %v4620_v40 }
0x14a3   :  { %4374 = vmatmul.mubr.msk.f32.vlgmr.msra.gmra.mxu1 %vm222_vm9, %v2801_v10 }
0x14a4   :  { %4383 = vmatprep.mubr.msk.f32.mxu1 %vm4621_vm8, %v4620_v40 }
0x155b   :  { %v5141_v11 = vpop.f32.mrf.mxu0 }
0x155d   :  { %v4360_v12 = vpop.f32.mrf.mxu0 }
0x155f   :  { %v5143_v13 = vpop.f32.mrf.mxu1  ;;  %v2796_v14 = vpop.f32.mrf.mxu0 }
0x1560   :  { %v2878_v49 = vmul.f32 0.35355338, %v2796_v14 }
0x1561   :  { %v4365_v15 = vpop.f32.mrf.mxu1  ;;  %v4370_v16 = vpop.f32.mrf.mxu0 }
0x1562   :  { %v2880_v18 = vadd.f32 %v5103_v42, %v2878_v49 }
0x1563   :  { %v2874_v20 = vpop.f32.mrf.mxu1 }
0x1564   :  { %v2879_v21 = vmul.f32 0.35355338, %v2874_v20  ;;  %v2882_v22 = vsel %vm222_vm9, %v2880_v18, -inf }
0x1565   :  { %2883 = vmax.xlane.f32.xlu0 %v2882_v22  ;;  %v4375_v23 = vpop.f32.mrf.mxu1  ;;  %v4028_v22 = vld [vmem:[%s5320_s4 + $0x28] sm:$0xff] }
0x1566   :  { %v2881_v24 = vadd.f32 %v5103_v42, %v2879_v21  ;;  %v4029_v21 = vld [vmem:[%s5320_s4 + $0x30] sm:$0xff]  ;;  %v4027_v23 = vld [vmem:[%s5320_s4 + $0x20] sm:$0xff] }
0x1568   :  { %v2885_v25 = vsel %vm222_vm9, %v2881_v24, -inf }
0x1569   :  { %2886 = vmax.xlane.f32.xlu1 %v2885_v25 }
0x157a   :  { %2904 = vrot.lane.b32.xlu1 %v5045_v63, %s4629_s0 }
0x157b   :  { %2980 = vrot.lane.b32.xlu0 %v5043_v59, %s4629_s0 }
0x157e   :  { %3058 = vrot.lane.b32.xlu1 %v5045_v63, %s4630_s26 }
0x1582   :  { %3136 = vrot.lane.b32.xlu1 %v5043_v59, %s4630_s26 }
0x1586   :  { %3134 = vrot.lane.b32.xlu1 %v5043_v59, %s4631_s27 }
0x15ee   :  { %v2884_v26 = vpop.xlane.xlu0 %2883 }
0x15ef   :  { %v2888_v17 = vsub.f32 %v2880_v18, %v2884_v26 }
0x15f1   :  { %v2890_v27 = vmul.f32 1.442695, %v2888_v17 }
0x15f2   :  { %v2981_v28 = vpop.permute.xlu0 %2980  ;;  %v2887_v29 = vpop.xlane.xlu1 %2886 }
0x15f3   :  { %4525 = vpow2.f32 %v2890_v27  ;;  %v2889_v30 = vsub.f32 %v2881_v24, %v2887_v29  ;;  %4382 = vmatpush3.msra.mxu1 %v2981_v28 }
0x15f4   :  { %4391 = vmatprep.subr.mxu1 %v4620_v40 }
0x15f5   :  { %v2892_v31 = vmul.f32 1.442695, %v2889_v30 }
0x15f6   :  { %v2905_v32 = vpop.permute.xlu1 %2904 }
0x15f7   :  { %4527 = vpow2.f32 %v2892_v31  ;;  %4377 = vmatpush3.msra.mxu0 %v2905_v32 }
0x15f8   :  { %4386 = vmatprep.subr.mxu0 %v4620_v40 }
0x15fa   :  { %v3059_v46 = vpop.permute.xlu1 %3058 }
0x15fe   :  { %v3137_v48 = vpop.permute.xlu1 %3136 }
0x1600   :  { %v4526_v33 = vpop.eup %4525 }
0x1601   :  { %v2894_v35 = vsel %vm222_vm9, %v4526_v33, 0.0 }
0x1602   :  { %2895 = vadd.xlane.f32.xlu0 %v2894_v35  ;;  %v3135_v52 = vpop.permute.xlu1 %3134 }
0x1604   :  { %v4528_v37 = vpop.eup %4527 }
0x1605   :  { %v2897_v38 = vsel %vm222_vm9, %v4528_v37, 0.0 }
0x1606   :  { %2898 = vadd.xlane.f32.xlu0 %v2897_v38 }
0x161c   :  { %3056 = vrot.lane.b32.xlu0 %v5045_v63, %s4631_s27 }
0x168b   :  { %v2896_v41 = vpop.xlane.xlu0 %2895 }
0x168c   :  { %4529 = vrcp.f32 %v2896_v41 }
0x168f   :  { %v2899_v43 = vpop.xlane.xlu0 %2898 }
0x1690   :  { %4531 = vrcp.f32 %v2899_v43 }
0x1693   :  { %v3057_v51 = vpop.permute.xlu0 %3056 }
0x1699   :  { %v4530_v47 = vpop.eup %4529 }
0x169a   :  { %v2902_v39 = vmul.f32 %v4530_v47, %v4526_v33 }
0x169c   :  { %4379 = vmatmul.mubr.msk.f32.vlgmr.msra.gmra.mxu0 %vm222_vm9, %v2902_v39 }
0x169d   :  { %v4532_v36 = vpop.eup %4531  ;;  %4387 = vmatpush3.xpose.msk.msra.mxu0 %vm222_vm9, %v3059_v46  ;;  %4388 = vmatprep.mubr.msk.f32.mxu0 %vm4621_vm8, %v4620_v40 }
0x169e   :  { %v2903_v50 = vmul.f32 %v4532_v36, %v4528_v37  ;;  %4396 = vmatprep.subr.mxu0 %v4620_v40 }
0x16a0   :  { %4384 = vmatmul.mubr.msk.f32.vlgmr.msra.gmra.mxu1 %vm222_vm9, %v2903_v50  ;;  %4389 = vmatmul.mubr.msk.f32.vlgmr.msra.gmra.mxu0 %vm222_vm9, %v3057_v51 }
0x16a1   :  { %4392 = vmatpush3.xpose.msk.msra.mxu1 %vm222_vm9, %v3137_v48  ;;  %4393 = vmatprep.mubr.msk.f32.mxu1 %vm4621_vm8, %v4620_v40 }
0x16a2   :  { %4401 = vmatprep.subr.mxu1 %v4620_v40  ;;  %4398 = vmatprep.mubr.msk.f32.mxu0 %vm4621_vm8, %v4620_v40 }
0x16a4   :  { %4394 = vmatmul.mubr.msk.f32.vlgmr.msra.gmra.mxu1 %vm222_vm9, %v3135_v52 }
0x16a5   :  { %4403 = vmatprep.mubr.msk.f32.mxu1 %vm4621_vm8, %v4620_v40 }
0x175c   :  { %v2976_v53 = vpop.f32.mrf.mxu0 }
0x175e   :  { %v4380_v54 = vpop.f32.mrf.mxu0 }
0x1760   :  { %v3052_v55 = vpop.f32.mrf.mxu1  ;;  %v3130_v56 = vpop.f32.mrf.mxu0 }
0x1761   :  { %v3212_v57 = vmul.f32 0.35355338, %v3130_v56 }
0x1762   :  { %v4385_v44 = vpop.f32.mrf.mxu1  ;;  %v4390_v62 = vpop.f32.mrf.mxu0 }
0x1763   :  { %v3214_v61 = vadd.f32 %v5103_v42, %v3212_v57 }
0x1764   :  { %v3208_v0 = vpop.f32.mrf.mxu1 }
0x1765   :  { %v3213_v1 = vmul.f32 0.35355338, %v3208_v0  ;;  %v3216_v2 = vsel %vm222_vm9, %v3214_v61, -inf  ;;  %v4041_v0 = vld [vmem:[%s5324_s8 + $0x30] sm:$0xff] }
0x1766   :  { %3217 = vmax.xlane.f32.xlu0 %v3216_v2  ;;  %v4395_v3 = vpop.f32.mrf.mxu1  ;;  %v4039_v2 = vld [vmem:[%s5324_s8 + $0x20] sm:$0xff] }
0x1767   :  { %v3215_v4 = vadd.f32 %v5103_v42, %v3213_v1  ;;  %v4040_v1 = vld [vmem:[%s5324_s8 + $0x28] sm:$0xff]  ;;  %v4054_v3 = vld [vmem:[%s5326_s10 + $0x78] sm:$0xff] }
0x1769   :  { %v3219_v5 = vsel %vm222_vm9, %v3215_v4, -inf }
0x176a   :  { %3220 = vmax.xlane.f32.xlu1 %v3219_v5  ;;  %v4052_v5 = vld [vmem:[%s5326_s10 + $0x68] sm:$0xff] }
0x177b   :  { %3238 = vrot.lane.b32.xlu1 %v5045_v63, %s5341_s3 }
0x177f   :  { %3392 = vrot.lane.b32.xlu1 %v5141_v11, %s5342_s19 }
0x1783   :  { %3394 = vrot.lane.b32.xlu1 %v5143_v13, %s5342_s19 }
0x1787   :  { %3402 = vrot.lane.b32.xlu1 %v3052_v55, %s5343_s20 }
0x17ef   :  { %v3218_v40 = vpop.xlane.xlu0 %3217 }
0x17f0   :  { %v3222_v45 = vsub.f32 %v3214_v61, %v3218_v40  ;;  %v4051_v40 = vld [vmem:[%s5326_s10 + $0x60] sm:$0xff] }
0x17f2   :  { %v3224_v6 = vmul.f32 1.442695, %v3222_v45 }
0x17f3   :  { %v3221_v7 = vpop.xlane.xlu1 %3220 }
0x17f4   :  { %4533 = vpow2.f32 %v3224_v6  ;;  %v3223_v42 = vsub.f32 %v3215_v4, %v3221_v7  ;;  %v4053_v4 = vld [vmem:[%s5326_s10 + $0x70] sm:$0xff] }
0x17f6   :  { %v3226_v8 = vmul.f32 1.442695, %v3223_v42 }
0x17f7   :  { %v3239_v9 = vpop.permute.xlu1 %3238 }
0x17f8   :  { %4535 = vpow2.f32 %v3226_v8  ;;  %4397 = vmatpush3.msra.mxu0 %v3239_v9 }
0x17fb   :  { %v3393_v27 = vpop.permute.xlu1 %3392 }
0x17fc   :  { %v3414_v30 = vsel %vm222_vm9, %v5099_v19, %v3393_v27  ;;  %v4032_v19 = vld [vmem:[%s5321_s5 + $0x1] ss:$0 sm:$0xff] }
0x17ff   :  { %v3395_v28 = vpop.permute.xlu1 %3394 }
0x1800   :  { %v3415_v37 = vsel %vm222_vm9, %v5101_v34, %v3395_v28 }
0x1801   :  { %v4534_v10 = vpop.eup %4533 }
0x1802   :  { %v3228_v63 = vsel %vm222_vm9, %v4534_v10, 0.0 }
0x1803   :  { %3229 = vadd.xlane.f32.xlu0 %v3228_v63  ;;  %v3403_v31 = vpop.permute.xlu1 %3402  ;;  %v4037_v63 = vld [vmem:[%s5322_s6 + $0x1] ss:$0 sm:$0xff] }
0x1804   :  { %v3417_v38 = vsel %vm1580_vm11, %v3415_v37, %v3403_v31 }
0x1805   :  { %v4536_v11 = vpop.eup %4535 }
0x1806   :  { %v3231_v12 = vsel %vm222_vm9, %v4536_v11, 0.0 }
0x1807   :  { %3232 = vadd.xlane.f32.xlu0 %v3231_v12  ;;  %v4038_v12 = vld [vmem:[%s5323_s7 + $0x1] ss:$0 sm:$0xff] }
0x181d   :  { %3314 = vrot.lane.b32.xlu0 %v5043_v59, %s5341_s3  ;;  %v4030_v59 = vld [vmem:[%s5320_s4 + $0x38] sm:$0xff] }
0x181e   :  { %4406 = vmatprep.subr.mxu0 %v4030_v59 }
0x1821   :  { %3400 = vrot.lane.b32.xlu0 %v2976_v53, %s5343_s20 }
0x188c   :  { %v3230_v13 = vpop.xlane.xlu0 %3229 }
0x188d   :  { %4537 = vrcp.f32 %v3230_v13 }
0x1890   :  { %v3233_v14 = vpop.xlane.xlu0 %3232 }
0x1891   :  { %4539 = vrcp.f32 %v3233_v14 }
0x1894   :  { %v3315_v49 = vpop.permute.xlu0 %3314 }
0x1895   :  { %4402 = vmatpush3.msra.mxu1 %v3315_v49 }
0x1898   :  { %v3401_v29 = vpop.permute.xlu0 %3400 }
0x1899   :  { %v3416_v32 = vsel %vm1580_vm11, %v3414_v30, %v3401_v29  ;;  %v4056_v29 = vld [vmem:[%s5327_s11 + $0x1] ss:$0 sm:$0xff] }
0x189a   :  { %v4538_v15 = vpop.eup %4537 }
0x189b   :  { %v3236_v16 = vmul.f32 %v4538_v15, %v4534_v10 }
0x189d   :  { %4399 = vmatmul.mubr.msk.f32.vlgmr.msra.gmra.mxu0 %vm222_vm9, %v3236_v16 }
0x189e   :  { %v4540_v18 = vpop.eup %4539  ;;  %4407 = vmatpush3.msra.mxu0 %v4030_v59  ;;  %v4049_v59 = vld [vmem:[%s5326_s10 + $0x50] sm:$0xff] }
0x189f   :  { %v3237_v20 = vmul.f32 %v4540_v18, %v4536_v11  ;;  %4408 = vmatprep.subr.mxu0 %v4029_v21 }
0x18a0   :  { %4409 = vmatpush3.msra.mxu0 %v4029_v21  ;;  %v4048_v21 = vld [vmem:[%s5326_s10 + $0x48] sm:$0xff] }
0x18a1   :  { %4404 = vmatmul.mubr.msk.f32.vlgmr.msra.gmra.mxu1 %vm222_vm9, %v3237_v20  ;;  %4410 = vmatprep.subr.mxu0 %v4028_v22  ;;  %v4050_v20 = vld [vmem:[%s5326_s10 + $0x58] sm:$0xff] }
0x18a2   :  { %4411 = vmatpush3.msra.mxu0 %v4028_v22  ;;  %v4047_v22 = vld [vmem:[%s5326_s10 + $0x40] sm:$0xff] }
0x18a3   :  { %4412 = vmatprep.subr.mxu0 %v4027_v23 }
0x18a4   :  { %4413 = vmatpush3.msra.mxu0 %v4027_v23  ;;  %v4044_v23 = vld [vmem:[%s5325_s9 + $0x1] ss:$0 sm:$0xff] }
0x18a5   :  { %4428 = vmatprep.subr.mxu0 %v4054_v3 }
0x195d   :  { %v3310_v24 = vpop.f32.mrf.mxu0 }
0x195e   :  { %3408 = vrot.lane.b32.xlu0 %v3310_v24, %s5344_s16 }
0x195f   :  { %v4400_v25 = vpop.f32.mrf.mxu0 }
0x1961   :  { %v3386_v26 = vpop.f32.mrf.mxu1 }
0x1962   :  { %3410 = vrot.lane.b32.xlu1 %v3386_v26, %s5344_s16 }
0x1963   :  { %v4405_v17 = vpop.f32.mrf.mxu1 }
0x19d0   :  { %v3409_v33 = vpop.permute.xlu0 %3408 }
0x19d1   :  { %v3418_v35 = vsel %vm1583_vm10, %v3416_v32, %v3409_v33 }
0x19d2   :  { %4414 = vmatprep.mubr.msk.f32.mxu0 %vm139_vm7, %v3418_v35 }
0x19d4   :  { %v3411_v41 = vpop.permute.xlu1 %3410 }
0x19d5   :  { %v3419_v43 = vsel %vm1583_vm10, %v3417_v38, %v3411_v41 }
0x19d6   :  { %4415 = vmatmul.mubr.msk.f32.vlgmr.msra.gmra.mxu0 %vm139_vm7, %v3419_v43 }
0x19d7   :  { %4429 = vmatpush3.msra.mxu0 %v4054_v3 }
0x19d8   :  { %4430 = vmatprep.subr.mxu0 %v4053_v4 }
0x19d9   :  { %4431 = vmatpush3.msra.mxu0 %v4053_v4  ;;  %v4062_v4 = vld [vmem:[%s5329_s13 + $0x1] ss:$0 sm:$0xff] }
0x19da   :  { %4432 = vmatprep.subr.mxu0 %v4052_v5 }
0x19db   :  { %4433 = vmatpush3.msra.mxu0 %v4052_v5 }
0x19dc   :  { %4434 = vmatprep.subr.mxu0 %v4051_v40 }
0x19dd   :  { %4435 = vmatpush3.msra.mxu0 %v4051_v40 }
0x19de   :  { %4436 = vmatprep.subr.mxu0 %v4050_v20 }
0x19df   :  { %4437 = vmatpush3.msra.mxu0 %v4050_v20 }
0x19e0   :  { %4438 = vmatprep.subr.mxu0 %v4049_v59 }
0x19e1   :  { %4439 = vmatpush3.msra.mxu0 %v4049_v59 }
0x19e2   :  { %4440 = vmatprep.subr.mxu0 %v4048_v21 }
0x19e3   :  { %4441 = vmatpush3.msra.mxu0 %v4048_v21 }
0x19e4   :  { %4442 = vmatprep.subr.mxu0 %v4047_v22 }
0x19e5   :  { %4443 = vmatpush3.msra.mxu0 %v4047_v22 }
0x1a96   :  { %v4416_v46 = vpop.f32.mrf.mxu0 }
0x1a97   :  { %v3511_v47 = vadd.f32 %v4416_v46, %v4032_v19 }
0x1a98   :  { %v3505_v39 = vpop.f32.mrf.mxu0 }
0x1a99   :  { %v3515_v36 = vadd.f32 %v3511_v47, %v5032_v60  ;;  %v3506_v48 = vadd.f32 %v4032_v19, %v3505_v39 }
0x1a9b   :  { %v3523_v50 = vsel %vm139_vm7, %v3515_v36, 0.0  ;;  %v3514_v34 = vadd.f32 %v3506_v48, %v5030_v58  ;;  %v4042_v58 = vld [vmem:[%s5324_s8 + $0x38] sm:$0xff] }
0x1a9c   :  { %3524 = vadd.xlane.f32.xlu1 %v3523_v50  ;;  %4417 = vmatprep.subr.mxu1 %v4042_v58 }
0x1a9d   :  { %v3520_v51 = vsel %vm139_vm7, %v3514_v34, 0.0  ;;  %4418 = vmatpush3.msra.mxu1 %v4042_v58 }
0x1a9e   :  { %3521 = vadd.xlane.f32.xlu0 %v3520_v51  ;;  %4419 = vmatprep.subr.mxu1 %v4041_v0 }
0x1a9f   :  { %4420 = vmatpush3.msra.mxu1 %v4041_v0 }
0x1aa0   :  { %4421 = vmatprep.subr.mxu1 %v4040_v1 }
0x1aa1   :  { %4422 = vmatpush3.msra.mxu1 %v4040_v1  ;;  %v4061_v1 = vld [vmem:[%s5328_s12 + $0x1] ss:$0 sm:$0xff]  ;;  %s4637_s12 = smov [#allocation7]  }
0x1aa2   :  { %4423 = vmatprep.subr.mxu1 %v4039_v2  ;;  %s3942_s13 = sshll.u32 %s4637_s12, 4  ;;  %s3943_s13 = int_to_ptr.vmem [resolvable:$true] %s3942_s13 }
0x1aa3   :  { %4424 = vmatpush3.msra.mxu1 %v4039_v2  ;;  %s4590_s3 = scalar_lea.vmem %s3943_s13, 256  ;;  %p4595_p11 = scmp.lt.s32.totalorder %s3943_s13, %s3943_s13 }
0x1aa4   :  { %p4591_p10 = scmp.ne.s32.totalorder %s3943_s13, %s4590_s3  ;;  %p4596_p12 = scmp.lt.s32.totalorder %s4590_s3, %s4590_s3 }
0x1aa6   :  { %p4597_p13 = por %p4596_p12, %p4595_p11 }
0x1aa8   :  { %p4598_p0 = pnand %p4597_p13, %p4591_p10 }
0x1b25   :  { %v3525_v52 = vpop.xlane.xlu1 %3524 }
0x1b26   :  { %v3527_v53 = vmul.f32 0.03125, %v3525_v52 }
0x1b27   :  { %v3522_v54 = vpop.xlane.xlu0 %3521 }
0x1b28   :  { %v3526_v55 = vmul.f32 0.03125, %v3522_v54  ;;  %v3529_v56 = vsub.f32 %v3515_v36, %v3527_v53 }
0x1b2a   :  { %v3528_v57 = vsub.f32 %v3514_v34, %v3526_v55  ;;  %v3531_v61 = vmul.f32 %v3529_v56, %v3529_v56 }
0x1b2c   :  { %v3530_v44 = vmul.f32 %v3528_v57, %v3528_v57  ;;  %v3535_v60 = vsel %vm139_vm7, %v3531_v61, 0.0  ;;  %v3809_v61 = vlaneseq }
0x1b2e   :  { %v3532_v62 = vsel %vm139_vm7, %v3530_v44, 0.0  ;;  %v4636_v44 = vmov 1966171168   ;;  %v3810_v58 = vshrl.u32 %v3809_v61, 7 }
0x1b2f   :  { %3533 = vadd.xlane.f32.xlu0 %v3532_v62  ;;  %v3807_v62 = vunpack.c.l.s4 %v4636_v44 }
0x1b33   :  { %3536 = vadd.xlane.f32.xlu0 %v3535_v60  ;;  %v3808_v60 = vunpack.c.0.s8 %v3807_v62 }
0x1b35   :  { %v3811_v5 = vsub.s32 %v3808_v60, %v3810_v58 }
0x1bb8   :  { %v3534_v45 = vpop.xlane.xlu0 %3533 }
0x1bb9   :  { %v3538_v6 = vmul.f32 0.03125, %v3534_v45 }
0x1bbb   :  { %v3540_v7 = vadd.f32 1e-05, %v3538_v6 }
0x1bbc   :  { %v3537_v42 = vpop.xlane.xlu0 %3536 }
0x1bbd   :  { %4541 = vrsqrt.f32 %v3540_v7  ;;  %v3539_v8 = vmul.f32 0.03125, %v3537_v42 }
0x1bbf   :  { %v3541_v9 = vadd.f32 1e-05, %v3539_v8 }
0x1bc1   :  { %4543 = vrsqrt.f32 %v3541_v9 }
0x1bca   :  { %v4542_v10 = vpop.eup %4541 }
0x1bcb   :  { %v3544_v11 = vmul.f32 %v4542_v10, %v3528_v57 }
0x1bcd   :  { %v3552_v13 = vmul.f32 %v4037_v63, %v3544_v11 }
0x1bce   :  { %v4544_v14 = vpop.eup %4543 }
0x1bcf   :  { %v3545_v49 = vmul.f32 %v4544_v14, %v3529_v56  ;;  %v3560_v15 = vadd.f32 %v4038_v12, %v3552_v13 }
0x1bd1   :  { %v3553_v16 = vmul.f32 %v4037_v63, %v3545_v49  ;;  %4425 = vmatprep.mubr.msk.f32.mxu1 %vm139_vm7, %v3560_v15 }
0x1bd3   :  { %v3561_v18 = vadd.f32 %v4038_v12, %v3553_v16 }
0x1bd5   :  { %4426 = vmatmul.mubr.msk.f32.vlgmr.msra.gmra.mxu1 %vm139_vm7, %v3561_v18 }
0x1c95   :  { %v4427_v24 = vpop.f32.mrf.mxu1 }
0x1c96   :  { %v3653_v25 = vadd.f32 %v4427_v24, %v4044_v23 }
0x1c97   :  { %v3647_v26 = vpop.f32.mrf.mxu1 }
0x1c98   :  { %v3648_v17 = vadd.f32 %v4044_v23, %v3647_v26  ;;  %v3657_v28 = vmax.f32 %v3653_v25, 0.0 }
0x1c9a   :  { %v3656_v27 = vmax.f32 %v3648_v17, 0.0 }
0x1c9c   :  { %4444 = vmatprep.mubr.msk.f32.mxu0 %vm1834_vm12, %v3656_v27 }
0x1c9d   :  { %4445 = vmatmul.mubr.msk.f32.vlgmr.msra.gmra.mxu0 %vm1834_vm12, %v3657_v28 }
0x1d5d   :  { %v4446_v30 = vpop.f32.mrf.mxu0 }
0x1d5e   :  { %v3753_v31 = vadd.f32 %v4446_v30, %v4056_v29 }
0x1d5f   :  { %v3747_v32 = vpop.f32.mrf.mxu0 }
0x1d60   :  { %v3748_v33 = vadd.f32 %v4056_v29, %v3747_v32  ;;  %v3757_v35 = vadd.f32 %v3753_v31, %v3561_v18 }
0x1d62   :  { %v3756_v37 = vadd.f32 %v3748_v33, %v3560_v15  ;;  %v3765_v38 = vsel %vm139_vm7, %v3757_v35, 0.0 }
0x1d63   :  { %3766 = vadd.xlane.f32.xlu0 %v3765_v38 }
0x1d64   :  { %v3762_v41 = vsel %vm139_vm7, %v3756_v37, 0.0 }
0x1d65   :  { %3763 = vadd.xlane.f32.xlu1 %v3762_v41 }
0x1dec   :  { %v3767_v43 = vpop.xlane.xlu0 %3766 }
0x1ded   :  { %v3769_v19 = vmul.f32 0.03125, %v3767_v43 }
0x1dee   :  { %v3764_v46 = vpop.xlane.xlu1 %3763 }
0x1def   :  { %v3771_v47 = vsub.f32 %v3757_v35, %v3769_v19  ;;  %v3768_v39 = vmul.f32 0.03125, %v3764_v46 }
0x1df1   :  { %v3770_v36 = vsub.f32 %v3756_v37, %v3768_v39  ;;  %v3773_v48 = vmul.f32 %v3771_v47, %v3771_v47 }
0x1df3   :  { %v3777_v50 = vsel %vm139_vm7, %v3773_v48, 0.0  ;;  %v3772_v34 = vmul.f32 %v3770_v36, %v3770_v36 }
0x1df4   :  { %3778 = vadd.xlane.f32.xlu0 %v3777_v50 }
0x1df5   :  { %v3774_v51 = vsel %vm139_vm7, %v3772_v34, 0.0 }
0x1df6   :  { %3775 = vadd.xlane.f32.xlu1 %v3774_v51 }
0x1e7d   :  { %v3779_v52 = vpop.xlane.xlu0 %3778 }
0x1e7e   :  { %v3781_v53 = vmul.f32 0.03125, %v3779_v52 }
0x1e7f   :  { %v3776_v54 = vpop.xlane.xlu1 %3775 }
0x1e80   :  { %v3783_v55 = vadd.f32 1e-05, %v3781_v53  ;;  %v3780_v56 = vmul.f32 0.03125, %v3776_v54 }
0x1e82   :  { %4545 = vrsqrt.f32 %v3783_v55  ;;  %v3782_v57 = vadd.f32 1e-05, %v3780_v56 }
0x1e84   :  { %4547 = vrsqrt.f32 %v3782_v57 }
0x1e8f   :  { %v4546_v0 = vpop.eup %4545 }
0x1e90   :  { %v3787_v2 = vmul.f32 %v4546_v0, %v3771_v47 }
0x1e91   :  { %v4548_v3 = vpop.eup %4547 }
0x1e92   :  { %v3795_v40 = vmul.f32 %v4061_v1, %v3787_v2  ;;  %v3786_v45 = vmul.f32 %v4548_v3, %v3770_v36 }
0x1e94   :  { %v3803_v6 = vadd.f32 %v4062_v4, %v3795_v40  ;;  %v3794_v7 = vmul.f32 %v4061_v1, %v3786_v45 }
0x1e96   :  { %v3872_v42 = vcombine.high %v3803_v6, %v3803_v6  ;;  %v3879_v8 = vrot.slane %v3803_v6, %v3811_v5  ;;  %v3802_v9 = vadd.f32 %v4062_v4, %v3794_v7 }
0x1e98   :  { %v3886_v10 = vrot.slane %v3872_v42, %v3811_v5  ;;  %v3887_v63 = vcombine.high %v3879_v8, %v3879_v8  ;;  %v3895_v11 = vrot.slane %v3879_v8, %v3811_v5  ;;  %v3805_v12 = vcombine.high %v3802_v9, %v3802_v9 }
0x1e99   :  { %v3812_v13 = vrot.slane %v3802_v9, %v3811_v5 }
0x1e9a   :  { %v3888_v14 = vcombine.high %v3886_v10, %v3886_v10  ;;  %v3902_v49 = vrot.slane %v3886_v10, %v3811_v5  ;;  %v3909_v15 = vrot.slane %v3887_v63, %v3811_v5  ;;  %v3917_v16 = vcombine.high %v3895_v11, %v3895_v11  ;;  %3929 = vst.msk [vmem:[#allocation7 + $0x1] sm:$0x1] %vm3862_vm13, %v3895_v11 }
0x1e9b   :  { %v3819_v18 = vrot.slane %v3805_v12, %v3811_v5  ;;  %v3820_v20 = vcombine.high %v3812_v13, %v3812_v13  ;;  %v3828_v59 = vrot.slane %v3812_v13, %v3811_v5 }
0x1e9c   :  { %v3916_v21 = vrot.slane %v3888_v14, %v3811_v5  ;;  %v3918_v22 = vcombine.high %v3902_v49, %v3902_v49  ;;  %v3919_v23 = vcombine.high %v3909_v15, %v3909_v15  ;;  %3930 = vst.msk [vmem:[#allocation7 + $0x3] sm:$0x1] %vm3862_vm13, %v3909_v15  ;;  %3931 = vst.msk [vmem:[#allocation7 + $0x5] sm:$0x1] %vm3862_vm13, %v3917_v16 }
0x1e9d   :  { %3933 = vst.msk [vmem:[#allocation7 + $0x9] sm:$0x1] %vm3862_vm13, %v3902_v49  ;;  %v3821_v24 = vcombine.high %v3819_v18, %v3819_v18  ;;  %v3835_v25 = vrot.slane %v3819_v18, %v3811_v5  ;;  %v3842_v26 = vrot.slane %v3820_v20, %v3811_v5  ;;  %v3850_v17 = vcombine.high %v3828_v59, %v3828_v59 }
0x1e9e   :  { %3863 = vst.msk [vmem:[#allocation7] sm:$0x1] %vm3862_vm13, %v3828_v59  ;;  %v3920_v27 = vcombine.high %v3916_v21, %v3916_v21  ;;  %3932 = vst.msk [vmem:[#allocation7 + $0x7] sm:$0x1] %vm3862_vm13, %v3919_v23 }
0x1e9f   :  { %3934 = vst.msk [vmem:[#allocation7 + $0xb] sm:$0x1] %vm3862_vm13, %v3916_v21  ;;  %3935 = vst.msk [vmem:[#allocation7 + $0xd] sm:$0x1] %vm3862_vm13, %v3918_v22  ;;  %v3849_v28 = vrot.slane %v3821_v24, %v3811_v5  ;;  %v3851_v29 = vcombine.high %v3835_v25, %v3835_v25  ;;  %v3852_v30 = vcombine.high %v3842_v26, %v3842_v26 }
0x1ea0   :  { %3864 = vst.msk [vmem:[#allocation7 + $0x2] sm:$0x1] %vm3862_vm13, %v3842_v26  ;;  %3865 = vst.msk [vmem:[#allocation7 + $0x4] sm:$0x1] %vm3862_vm13, %v3850_v17 }
0x1ea1   :  { %3867 = vst.msk [vmem:[#allocation7 + $0x8] sm:$0x1] %vm3862_vm13, %v3835_v25  ;;  %3936 = vst.msk [vmem:[#allocation7 + $0xf] sm:$0x1] %vm3862_vm13, %v3920_v27  ;;  %v3853_v31 = vcombine.high %v3849_v28, %v3849_v28 }
0x1ea2   :  { %3866 = vst.msk [vmem:[#allocation7 + $0x6] sm:$0x1] %vm3862_vm13, %v3852_v30  ;;  %3868 = vst.msk [vmem:[#allocation7 + $0xa] sm:$0x1] %vm3862_vm13, %v3849_v28 }
0x1ea3   :  { %3869 = vst.msk [vmem:[#allocation7 + $0xc] sm:$0x1] %vm3862_vm13, %v3851_v29  ;;  %3870 = vst.msk [vmem:[#allocation7 + $0xe] sm:$0x1] %vm3862_vm13, %v3853_v31 }
0x1ea4   :  { %4601 = shalt.err (!%p4598_p0)
}
0x1ea5   :  { %s5345_s19 = smov 2   ;;  %s5346_s20 = smov 32  }
0x1ea6   :  { %3948 = dma.vmem_to_hbm [thread:$0]  %s3943_s13, 256, %s5330_s14, [#allocation4], %s5346_s20, %s5346_s20, %s5345_s19  }
0x1ea7   :  { %4614 = dma.done.wait [#allocation4], 256  }
0x1ea8   :  { %4615 = vsyncadd [#allocation4], 4294967040 }
0x1ea9   :  { %3952 = vsyncpa [#allocation3], 1 }
0x1eaa   :  { %3953 = vsyncpa [#allocation6], 1 }
0x1eab   :  { %3954 = vsyncpa [#allocation4], 1 }

</bundles_post_ra>
